<compile_context>
chip_gen: v7x
topology: tpu7x:2x2x1
jax: 0.10.0
libtpu: 0.0.40
codegen_flags: <defaults>
</compile_context>

<pallas_src>
import functools

import numpy as np
import jax
import jax.numpy as jnp
from jax.experimental import pallas as pl
from jax.experimental.pallas import tpu as pltpu  # noqa: F401  (kept for TPU-specific tweaks)

ACTIVATION = "leaky_relu"   # stands in for args.activation
NEG_SLOPE = 0.01            # nn.LeakyReLU default negative_slope
ENC_HIDDEN = 32
DR_OUT = 8
FC_HIDDEN0 = 256
FC_HIDDEN1 = 32
N_CLASSES = 2
OUT_W = 128                 # lane width of the packed output slab
ASN_OFF = 32                # lane offset of the flattened assignment in the packed output


# ----------------------------------------------------------------------------
# activation (usable both inside kernels and in the pure-JAX reference)
# ----------------------------------------------------------------------------
def _act(x, kind):
    if kind == "leaky_relu":
        return jnp.where(x > 0, x, NEG_SLOPE * x)
    if kind == "gelu":  # exact (erf) gelu, matching nn.GELU default
        return 0.5 * x * (1.0 + jax.lax.erf(x * 0.7071067811865476))
    if kind == "elu":
        return jnp.where(x > 0, x, jnp.expm1(jnp.minimum(x, 0.0)))
    if kind == "none":
        return x
    raise ValueError(kind)


# ----------------------------------------------------------------------------
# Fully fused, grid-free forward kernel.  Everything is (bz, lanes) slabs.
#   QP stack -> DEC encoder MLP -> cluster assignment + soft pooling
#   -> dim_reduction -> fc head -> one packed (bz, 128) output
# ----------------------------------------------------------------------------
def _fused_kernel(corr_ref,
                  wr_ref, br_ref, wg_ref, bg_ref,
                  e0w_ref, e0b_ref, e1w_ref, e1b_ref, e2w_ref, e2b_ref,
                  cent_ref, ones_ref, dbias_ref,
                  tile_ref, bc_ref, sum2_ref, drb_ref,
                  f0w_ref, f0b_ref, f1w_ref, f1b_ref, f2w_ref, f2b_ref,
                  out_ref, *, layers, activation):
    f32 = jnp.float32
    corr = corr_ref[...].astype(f32)                                   # (bz, N*C)

    # ---- quadratic_perceptron stack on flat layout (kron block-diag weights) --
    topo = corr
    for l in range(layers):
        ft = jnp.dot(corr, wr_ref[l], preferred_element_type=f32) + br_ref[l]
        f2 = jnp.dot(topo * topo, wg_ref[l], preferred_element_type=f32) + bg_ref[l]
        topo = _act(topo * ft + f2, activation)

    # ---- DEC encoder MLP: input is already flat, no reshape needed ----------
    h = _act(jnp.dot(topo, e0w_ref[...], preferred_element_type=f32)
             + e0b_ref[...], "leaky_relu")
    h = _act(jnp.dot(h, e1w_ref[...], preferred_element_type=f32)
             + e1b_ref[...], "leaky_relu")
    enc = jnp.dot(h, e2w_ref[...], preferred_element_type=f32) + e2b_ref[...]   # (bz, N*C)

    # ---- cluster assignment, landing directly at output lanes [ASN_OFF, +N*K) --
    # TODO(synk): DEC / ClusterAssignment source was not provided with the
    #             module; this follows the reference BNT project_assignment
    #             formula ((enc @ centers^T)^2, L1-normalized over clusters).
    a = jnp.dot(enc, cent_ref[...], preferred_element_type=f32)                 # (bz, OUT_W)
    a = a * a
    denom = jnp.dot(a, ones_ref[...], preferred_element_type=f32) + dbias_ref[...]
    a = a / denom                                   # dead lanes: 0/1 -> 0, exact divide

    # ---- soft pooling + dim_reduction as 3 flat matmuls ----------------------
    # enc_t[b, k*NC + n*C + c] = enc[b,n,c];  a_bc[b, k*NC + n*C + c] = a[b,n,k]
    enc_t = jnp.dot(enc, tile_ref[...], preferred_element_type=f32)             # (bz, K*N*C)
    a_bc = jnp.dot(a, bc_ref[...], preferred_element_type=f32)                  # (bz, K*N*C)
    # sum2 folds (sum over n and c) with the dim_reduction weight:  -> (bz, K*8)
    g = _act(jnp.dot(enc_t * a_bc, sum2_ref[...], preferred_element_type=f32)
             + drb_ref[...], "leaky_relu")

    # ---- fc head; fc2 weight/bias zero-padded to OUT_W lanes -----------------
    z = _act(jnp.dot(g, f0w_ref[...], preferred_element_type=f32)
             + f0b_ref[...], "leaky_relu")
    z = _act(jnp.dot(z, f1w_ref[...], preferred_element_type=f32)
             + f1b_ref[...], "leaky_relu")
    res = jnp.dot(z, f2w_ref[...], preferred_element_type=f32) + f2b_ref[...]   # (bz, OUT_W)

    # Packed output: lanes [0:N_CLASSES) = logits, lanes [ASN_OFF:ASN_OFF+N*K) =
    # flattened assignment (the two contributions live in disjoint lanes).
    out_ref[...] = (res + a).astype(out_ref.dtype)


def quadratic_bn_forward(kparams, timeseries, corr):
    del timeseries  # unused in the reference forward
    bz, node_sz, corr_sz = corr.shape
    layers = kparams["wr_blk"].shape[0]
    K = kparams["dr_b_flat"].shape[1] // DR_OUT
    NK = node_sz * K
    corr_flat = corr.reshape(bz, node_sz * corr_sz)   # host-side reshape (free XLA op)

    kernel = functools.partial(_fused_kernel, layers=layers, activation=ACTIVATION)

    packed = pl.pallas_call(
        kernel,
        out_shape=jax.ShapeDtypeStruct((bz, OUT_W), jnp.float32),
        cost_estimate=pl.CostEstimate(flops=2_000_000, transcendentals=0,
                                      bytes_accessed=1_300_000),
    )(corr_flat,
      kparams["wr_blk"], kparams["br_flat"], kparams["wg_blk"], kparams["bg_flat"],
      kparams["enc0_w"], kparams["enc0_b"], kparams["enc1_w"], kparams["enc1_b"],
      kparams["enc2_w"], kparams["enc2_b"],
      kparams["cent_pad"], kparams["ones_blk"], kparams["denom_bias"],
      kparams["tile_mat"], kparams["bc_mat"], kparams["sum2"], kparams["dr_b_flat"],
      kparams["fc0_w"], kparams["fc0_b"], kparams["fc1_w"], kparams["fc1_b"],
      kparams["fc2_pad"], kparams["fc2_b_pad"])

    result = packed[:, :N_CLASSES]
    assignment = packed[:, ASN_OFF:ASN_OFF + NK].reshape(bz, node_sz, K)
    return result, assignment


# ----------------------------------------------------------------------------
# Parameter construction (deterministic, PyTorch-Linear-style uniform init) in
# the natural layout, plus a one-time transform into the kernel's flat layout.
# ----------------------------------------------------------------------------
def _linear_params(key, din, dout):
    k1, k2 = jax.random.split(key)
    bound = float(din) ** -0.5
    w = jax.random.uniform(k1, (dout, din), jnp.float32, -bound, bound)
    b = jax.random.uniform(k2, (dout,), jnp.float32, -bound, bound)
    return w.T, b  # (din, dout), (dout,)


def init_params(key, node_sz, corr_sz, layers, cluster_num, enc_hidden=ENC_HIDDEN):
    keys = jax.random.split(key, 16)
    C, N, K, H = corr_sz, node_sz, cluster_num, enc_hidden
    wr, br, wg, bg = [], [], [], []
    for i in range(layers):
        kr, kg = jax.random.split(keys[i], 2)
        w, b = _linear_params(kr, C, C); wr.append(w); br.append(b)
        w, b = _linear_params(kg, C, C); wg.append(w); bg.append(b)
    p = {"qp_wr": jnp.stack(wr), "qp_br": jnp.stack(br),
         "qp_wg": jnp.stack(wg), "qp_bg": jnp.stack(bg)}
    # encoder: Linear(N*C,32) -> LReLU -> Linear(32,32) -> LReLU -> Linear(32,N*C)
    p["enc0_w"], p["enc0_b"] = _linear_params(keys[8], N * C, H)
    p["enc1_w"], p["enc1_b"] = _linear_params(keys[9], H, H)
    p["enc2_w"], p["enc2_b"] = _linear_params(keys[10], H, N * C)
    # cluster centers (orthogonalized rows, as DEC(orthogonal=True))
    centers = jax.random.normal(keys[11], (K, C), jnp.float32)
    q, _ = jnp.linalg.qr(centers.T)                  # (C, K) orthonormal cols
    p["centers"] = q[:, :K].T                        # (K, C)
    # dim_reduction: Linear(C, 8) + LeakyReLU
    p["dr_w"], p["dr_b"] = _linear_params(keys[12], C, DR_OUT)
    # fc head: Linear(8*K,256) -> LReLU -> Linear(256,32) -> LReLU -> Linear(32,2)
    p["fc0_w"], p["fc0_b"] = _linear_params(keys[13], DR_OUT * K, FC_HIDDEN0)
    p["fc1_w"], p["fc1_b"] = _linear_params(keys[14], FC_HIDDEN0, FC_HIDDEN1)
    p["fc2_w"], p["fc2_b"] = _linear_params(keys[15], FC_HIDDEN1, N_CLASSES)
    return p


def prepare_kernel_params(p, node_sz, cluster_num):
    """One-time transform into the kernel's flat / block-diagonal layout."""
    N, K = node_sz, cluster_num
    L, C, _ = p["qp_wr"].shape
    H = p["enc1_w"].shape[0]
    NC, NK, KNC = N * C, N * K, cluster_num * N * C
    assert N_CLASSES <= ASN_OFF and ASN_OFF + NK <= OUT_W
    f32 = jnp.float32
    eyeN = jnp.eye(N, dtype=f32)

    kp = {}
    # QP: flat @ kron(I_N, W) == per-node matmul on the flattened sample
    kp["wr_blk"] = jnp.stack([jnp.kron(eyeN, p["qp_wr"][l]) for l in range(L)])
    kp["wg_blk"] = jnp.stack([jnp.kron(eyeN, p["qp_wg"][l]) for l in range(L)])
    kp["br_flat"] = jnp.stack([jnp.tile(p["qp_br"][l], N).reshape(1, NC) for l in range(L)])
    kp["bg_flat"] = jnp.stack([jnp.tile(p["qp_bg"][l], N).reshape(1, NC) for l in range(L)])

    kp["enc0_w"] = p["enc0_w"];              kp["enc0_b"] = p["enc0_b"].reshape(1, H)
    kp["enc1_w"] = p["enc1_w"];              kp["enc1_b"] = p["enc1_b"].reshape(1, H)
    kp["enc2_w"] = p["enc2_w"];              kp["enc2_b"] = p["enc2_b"].reshape(1, NC)

    # centers placed so the assignment lands at output lanes [ASN_OFF, ASN_OFF+NK)
    cent = jnp.zeros((NC, OUT_W), f32)
    kp["cent_pad"] = cent.at[:, ASN_OFF:ASN_OFF + NK].set(jnp.kron(eyeN, p["centers"].T))

    ones_blk = np.zeros((OUT_W, OUT_W), np.float32)
    ones_blk[ASN_OFF:ASN_OFF + NK, ASN_OFF:ASN_OFF + NK] = np.kron(
        np.eye(N, dtype=np.float32), np.ones((K, K), np.float32))
    kp["ones_blk"] = jnp.asarray(ones_blk)
    dbias = np.ones((1, OUT_W), np.float32)
    dbias[:, ASN_OFF:ASN_OFF + NK] = 0.0             # dead lanes divide by 1 (stay 0)
    kp["denom_bias"] = jnp.asarray(dbias)

    # pooling helpers: lane-tile of enc, broadcast of a, and segmented-sum folded
    # with the dim_reduction weight.
    kp["tile_mat"] = jnp.asarray(np.tile(np.eye(NC, dtype=np.float32), (1, K)))
    bc = np.zeros((OUT_W, KNC), np.float32)
    for n in range(N):
        for k in range(K):
            bc[ASN_OFF + n * K + k, k * NC + n * C:k * NC + (n + 1) * C] = 1.0
    kp["bc_mat"] = jnp.asarray(bc)
    summ = np.zeros((KNC, K * C), np.float32)        # SUM[k*NC+n*C+c, k*C+c] = 1
    for k in range(K):
        for n in range(N):
            for c in range(C):
                summ[k * NC + n * C + c, k * C + c] = 1.0
    kp["sum2"] = jnp.asarray(summ) @ jnp.kron(jnp.eye(K, dtype=f32), p["dr_w"])
    kp["dr_b_flat"] = jnp.tile(p["dr_b"], K).reshape(1, K * DR_OUT)

    kp["fc0_w"] = p["fc0_w"];  kp["fc0_b"] = p["fc0_b"].reshape(1, FC_HIDDEN0)
    kp["fc1_w"] = p["fc1_w"];  kp["fc1_b"] = p["fc1_b"].reshape(1, FC_HIDDEN1)
    kp["fc2_pad"] = jnp.zeros((FC_HIDDEN1, OUT_W), f32).at[:, :N_CLASSES].set(p["fc2_w"])
    kp["fc2_b_pad"] = jnp.zeros((1, OUT_W), f32).at[:, :N_CLASSES].set(
        p["fc2_b"].reshape(1, N_CLASSES))
    return kp


# ----------------------------------------------------------------------------
# Pure-JAX reference of the same math (used only for a sanity check in main)
# ----------------------------------------------------------------------------
def _reference_forward(params, corr, activation=ACTIVATION):
    bz, N, C = corr.shape
    L = params["qp_wr"].shape[0]
    topo = corr
    for l in range(L):
        ft = jnp.einsum("bnc,cd->bnd", corr, params["qp_wr"][l]) + params["qp_br"][l]
        f2 = jnp.einsum("bnc,cd->bnd", topo * topo, params["qp_wg"][l]) + params["qp_bg"][l]
        topo = _act(topo * ft + f2, activation)
    flat = topo.reshape(bz, N * C)
    h = _act(flat @ params["enc0_w"] + params["enc0_b"], "leaky_relu")
    h = _act(h @ params["enc1_w"] + params["enc1_b"], "leaky_relu")
    enc = (h @ params["enc2_w"] + params["enc2_b"]).reshape(bz, N, C)
    a = jnp.einsum("bnc,kc->bnk", enc, params["centers"])
    a = a * a
    a = a / jnp.sum(a, axis=-1, keepdims=True)
    pooled = jnp.einsum("bnk,bnc->bkc", a, enc)
    g = _act(jnp.einsum("bkc,cd->bkd", pooled, params["dr_w"]) + params["dr_b"],
             "leaky_relu").reshape(bz, -1)
    z = _act(g @ params["fc0_w"] + params["fc0_b"], "leaky_relu")
    z = _act(z @ params["fc1_w"] + params["fc1_b"], "leaky_relu")
    return z @ params["fc2_w"] + params["fc2_b"], a


# ----------------------------------------------------------------------------
if __name__ == "__main__":
    bz, node_sz, corr_sz, ts_sz = 2, 8, 16, 32
    layers, cluster_num = 2, 4

    key = jax.random.PRNGKey(0)
    kparam_key, kt, kc = jax.random.split(key, 3)
    params = init_params(kparam_key, node_sz, corr_sz, layers, cluster_num)
    kparams = prepare_kernel_params(params, node_sz, cluster_num)

    timeseries = jax.random.normal(kt, (bz, node_sz, ts_sz), jnp.float32)
    corr = jax.random.normal(kc, (bz, node_sz, corr_sz), jnp.float32)

    forward = jax.jit(quadratic_bn_forward)
    result, assignment = forward(kparams, timeseries, corr)
    result = jax.block_until_ready(result)

    assert result.shape == (bz, N_CLASSES), result.shape
    assert assignment.shape == (bz, node_sz, cluster_num), assignment.shape
    assert bool(jnp.all(jnp.isfinite(result)))

    ref_result, ref_assignment = _reference_forward(params, corr)
    assert bool(jnp.allclose(result, ref_result, rtol=1e-2, atol=1e-2)), (
        float(jnp.max(jnp.abs(result - ref_result))))
    assert bool(jnp.allclose(assignment, ref_assignment, rtol=1e-2, atol=1e-2)), (
        float(jnp.max(jnp.abs(assignment - ref_assignment))))

    print("KERNEL_OK")
</pallas_src>

<mosaic_0001>
module attributes {stable_mosaic.version = 11 : i64} {
  func.func @_fused_kernel(%arg0: memref<2x128xf32, #tpu.memory_space<vmem>>, %arg1: memref<2x128x128xf32, #tpu.memory_space<vmem>>, %arg2: memref<2x1x128xf32, #tpu.memory_space<vmem>>, %arg3: memref<2x128x128xf32, #tpu.memory_space<vmem>>, %arg4: memref<2x1x128xf32, #tpu.memory_space<vmem>>, %arg5: memref<128x32xf32, #tpu.memory_space<vmem>>, %arg6: memref<1x32xf32, #tpu.memory_space<vmem>>, %arg7: memref<32x32xf32, #tpu.memory_space<vmem>>, %arg8: memref<1x32xf32, #tpu.memory_space<vmem>>, %arg9: memref<32x128xf32, #tpu.memory_space<vmem>>, %arg10: memref<1x128xf32, #tpu.memory_space<vmem>>, %arg11: memref<128x128xf32, #tpu.memory_space<vmem>>, %arg12: memref<128x128xf32, #tpu.memory_space<vmem>>, %arg13: memref<1x128xf32, #tpu.memory_space<vmem>>, %arg14: memref<128x512xf32, #tpu.memory_space<vmem>>, %arg15: memref<128x512xf32, #tpu.memory_space<vmem>>, %arg16: memref<512x32xf32, #tpu.memory_space<vmem>>, %arg17: memref<1x32xf32, #tpu.memory_space<vmem>>, %arg18: memref<32x256xf32, #tpu.memory_space<vmem>>, %arg19: memref<1x256xf32, #tpu.memory_space<vmem>>, %arg20: memref<256x32xf32, #tpu.memory_space<vmem>>, %arg21: memref<1x32xf32, #tpu.memory_space<vmem>>, %arg22: memref<32x128xf32, #tpu.memory_space<vmem>>, %arg23: memref<1x128xf32, #tpu.memory_space<vmem>>, %arg24: memref<2x128xf32, #tpu.memory_space<vmem>>) attributes {dimension_semantics = [], scalar_prefetch = 0 : i64, scratch_operands = 0 : i64, tpu.core_type = #tpu.core_type<tc>} {
    %c0 = arith.constant 0 : index
    %c0_0 = arith.constant 0 : index
    %0 = vector.load %arg0[%c0, %c0_0] : memref<2x128xf32, #tpu.memory_space<vmem>>, vector<2x128xf32>
    %c0_1 = arith.constant 0 : index
    %c0_2 = arith.constant 0 : index
    %c0_3 = arith.constant 0 : index
    %1 = vector.load %arg1[%c0_1, %c0_2, %c0_3] : memref<2x128x128xf32, #tpu.memory_space<vmem>>, vector<1x128x128xf32>
    %2 = vector.shape_cast %1 : vector<1x128x128xf32> to vector<128x128xf32>
    %cst = arith.constant dense<0.000000e+00> : vector<2x128xf32>
    %3 = tpu.matmul %0, %2, %cst {dimension_numbers = #tpu.dot_dimension_numbers<[1], [0], [0], [1], [0, 0, 1, 1], [], []>} : vector<2x128xf32>, vector<128x128xf32>, vector<2x128xf32> -> vector<2x128xf32>
    %c0_4 = arith.constant 0 : index
    %c0_5 = arith.constant 0 : index
    %c0_6 = arith.constant 0 : index
    %4 = vector.load %arg2[%c0_4, %c0_5, %c0_6] : memref<2x1x128xf32, #tpu.memory_space<vmem>>, vector<1x1x128xf32>
    %5 = vector.shape_cast %4 : vector<1x1x128xf32> to vector<1x128xf32>
    %6 = vector.broadcast %5 : vector<1x128xf32> to vector<2x128xf32>
    %7 = arith.addf %3, %6 : vector<2x128xf32>
    %8 = arith.mulf %0, %0 : vector<2x128xf32>
    %c0_7 = arith.constant 0 : index
    %c0_8 = arith.constant 0 : index
    %c0_9 = arith.constant 0 : index
    %9 = vector.load %arg3[%c0_7, %c0_8, %c0_9] : memref<2x128x128xf32, #tpu.memory_space<vmem>>, vector<1x128x128xf32>
    %10 = vector.shape_cast %9 : vector<1x128x128xf32> to vector<128x128xf32>
    %cst_10 = arith.constant dense<0.000000e+00> : vector<2x128xf32>
    %11 = tpu.matmul %8, %10, %cst_10 {dimension_numbers = #tpu.dot_dimension_numbers<[1], [0], [0], [1], [0, 0, 1, 1], [], []>} : vector<2x128xf32>, vector<128x128xf32>, vector<2x128xf32> -> vector<2x128xf32>
    %c0_11 = arith.constant 0 : index
    %c0_12 = arith.constant 0 : index
    %c0_13 = arith.constant 0 : index
    %12 = vector.load %arg4[%c0_11, %c0_12, %c0_13] : memref<2x1x128xf32, #tpu.memory_space<vmem>>, vector<1x1x128xf32>
    %13 = vector.shape_cast %12 : vector<1x1x128xf32> to vector<1x128xf32>
    %14 = vector.broadcast %13 : vector<1x128xf32> to vector<2x128xf32>
    %15 = arith.addf %11, %14 : vector<2x128xf32>
    %16 = arith.mulf %0, %7 : vector<2x128xf32>
    %17 = arith.addf %16, %15 : vector<2x128xf32>
    %cst_14 = arith.constant 0.000000e+00 : f32
    %18 = vector.broadcast %cst_14 : f32 to vector<2x128xf32>
    %19 = arith.cmpf ogt, %17, %18 : vector<2x128xf32>
    %cst_15 = arith.constant 0.00999999977 : f32
    %20 = vector.broadcast %cst_15 : f32 to vector<2x128xf32>
    %21 = arith.mulf %20, %17 : vector<2x128xf32>
    %22 = arith.select %19, %17, %21 : vector<2x128xi1>, vector<2x128xf32>
    %c1 = arith.constant 1 : index
    %c0_16 = arith.constant 0 : index
    %c0_17 = arith.constant 0 : index
    %23 = vector.load %arg1[%c1, %c0_16, %c0_17] : memref<2x128x128xf32, #tpu.memory_space<vmem>>, vector<1x128x128xf32>
    %24 = vector.shape_cast %23 : vector<1x128x128xf32> to vector<128x128xf32>
    %cst_18 = arith.constant dense<0.000000e+00> : vector<2x128xf32>
    %25 = tpu.matmul %0, %24, %cst_18 {dimension_numbers = #tpu.dot_dimension_numbers<[1], [0], [0], [1], [0, 0, 1, 1], [], []>} : vector<2x128xf32>, vector<128x128xf32>, vector<2x128xf32> -> vector<2x128xf32>
    %c1_19 = arith.constant 1 : index
    %c0_20 = arith.constant 0 : index
    %c0_21 = arith.constant 0 : index
    %26 = vector.load %arg2[%c1_19, %c0_20, %c0_21] : memref<2x1x128xf32, #tpu.memory_space<vmem>>, vector<1x1x128xf32>
    %27 = vector.shape_cast %26 : vector<1x1x128xf32> to vector<1x128xf32>
    %28 = vector.broadcast %27 : vector<1x128xf32> to vector<2x128xf32>
    %29 = arith.addf %25, %28 : vector<2x128xf32>
    %30 = arith.mulf %22, %22 : vector<2x128xf32>
    %c1_22 = arith.constant 1 : index
    %c0_23 = arith.constant 0 : index
    %c0_24 = arith.constant 0 : index
    %31 = vector.load %arg3[%c1_22, %c0_23, %c0_24] : memref<2x128x128xf32, #tpu.memory_space<vmem>>, vector<1x128x128xf32>
    %32 = vector.shape_cast %31 : vector<1x128x128xf32> to vector<128x128xf32>
    %cst_25 = arith.constant dense<0.000000e+00> : vector<2x128xf32>
    %33 = tpu.matmul %30, %32, %cst_25 {dimension_numbers = #tpu.dot_dimension_numbers<[1], [0], [0], [1], [0, 0, 1, 1], [], []>} : vector<2x128xf32>, vector<128x128xf32>, vector<2x128xf32> -> vector<2x128xf32>
    %c1_26 = arith.constant 1 : index
    %c0_27 = arith.constant 0 : index
    %c0_28 = arith.constant 0 : index
    %34 = vector.load %arg4[%c1_26, %c0_27, %c0_28] : memref<2x1x128xf32, #tpu.memory_space<vmem>>, vector<1x1x128xf32>
    %35 = vector.shape_cast %34 : vector<1x1x128xf32> to vector<1x128xf32>
    %36 = vector.broadcast %35 : vector<1x128xf32> to vector<2x128xf32>
    %37 = arith.addf %33, %36 : vector<2x128xf32>
    %38 = arith.mulf %22, %29 : vector<2x128xf32>
    %39 = arith.addf %38, %37 : vector<2x128xf32>
    %cst_29 = arith.constant 0.000000e+00 : f32
    %40 = vector.broadcast %cst_29 : f32 to vector<2x128xf32>
    %41 = arith.cmpf ogt, %39, %40 : vector<2x128xf32>
    %cst_30 = arith.constant 0.00999999977 : f32
    %42 = vector.broadcast %cst_30 : f32 to vector<2x128xf32>
    %43 = arith.mulf %42, %39 : vector<2x128xf32>
    %44 = arith.select %41, %39, %43 : vector<2x128xi1>, vector<2x128xf32>
    %c0_31 = arith.constant 0 : index
    %c0_32 = arith.constant 0 : index
    %45 = vector.load %arg5[%c0_31, %c0_32] : memref<128x32xf32, #tpu.memory_space<vmem>>, vector<128x32xf32>
    %cst_33 = arith.constant dense<0.000000e+00> : vector<2x32xf32>
    %46 = tpu.matmul %44, %45, %cst_33 {dimension_numbers = #tpu.dot_dimension_numbers<[1], [0], [0], [1], [0, 0, 1, 1], [], []>} : vector<2x128xf32>, vector<128x32xf32>, vector<2x32xf32> -> vector<2x32xf32>
    %c0_34 = arith.constant 0 : index
    %c0_35 = arith.constant 0 : index
    %47 = vector.load %arg6[%c0_34, %c0_35] : memref<1x32xf32, #tpu.memory_space<vmem>>, vector<1x32xf32>
    %48 = vector.broadcast %47 : vector<1x32xf32> to vector<2x32xf32>
    %49 = arith.addf %46, %48 : vector<2x32xf32>
    %cst_36 = arith.constant 0.000000e+00 : f32
    %50 = vector.broadcast %cst_36 : f32 to vector<2x32xf32>
    %51 = arith.cmpf ogt, %49, %50 : vector<2x32xf32>
    %cst_37 = arith.constant 0.00999999977 : f32
    %52 = vector.broadcast %cst_37 : f32 to vector<2x32xf32>
    %53 = arith.mulf %52, %49 : vector<2x32xf32>
    %54 = arith.select %51, %49, %53 : vector<2x32xi1>, vector<2x32xf32>
    %c0_38 = arith.constant 0 : index
    %c0_39 = arith.constant 0 : index
    %55 = vector.load %arg7[%c0_38, %c0_39] : memref<32x32xf32, #tpu.memory_space<vmem>>, vector<32x32xf32>
    %cst_40 = arith.constant dense<0.000000e+00> : vector<2x32xf32>
    %56 = tpu.matmul %54, %55, %cst_40 {dimension_numbers = #tpu.dot_dimension_numbers<[1], [0], [0], [1], [0, 0, 1, 1], [], []>} : vector<2x32xf32>, vector<32x32xf32>, vector<2x32xf32> -> vector<2x32xf32>
    %c0_41 = arith.constant 0 : index
    %c0_42 = arith.constant 0 : index
    %57 = vector.load %arg8[%c0_41, %c0_42] : memref<1x32xf32, #tpu.memory_space<vmem>>, vector<1x32xf32>
    %58 = vector.broadcast %57 : vector<1x32xf32> to vector<2x32xf32>
    %59 = arith.addf %56, %58 : vector<2x32xf32>
    %cst_43 = arith.constant 0.000000e+00 : f32
    %60 = vector.broadcast %cst_43 : f32 to vector<2x32xf32>
    %61 = arith.cmpf ogt, %59, %60 : vector<2x32xf32>
    %cst_44 = arith.constant 0.00999999977 : f32
    %62 = vector.broadcast %cst_44 : f32 to vector<2x32xf32>
    %63 = arith.mulf %62, %59 : vector<2x32xf32>
    %64 = arith.select %61, %59, %63 : vector<2x32xi1>, vector<2x32xf32>
    %c0_45 = arith.constant 0 : index
    %c0_46 = arith.constant 0 : index
    %65 = vector.load %arg9[%c0_45, %c0_46] : memref<32x128xf32, #tpu.memory_space<vmem>>, vector<32x128xf32>
    %cst_47 = arith.constant dense<0.000000e+00> : vector<2x128xf32>
    %66 = tpu.matmul %64, %65, %cst_47 {dimension_numbers = #tpu.dot_dimension_numbers<[1], [0], [0], [1], [0, 0, 1, 1], [], []>} : vector<2x32xf32>, vector<32x128xf32>, vector<2x128xf32> -> vector<2x128xf32>
    %c0_48 = arith.constant 0 : index
    %c0_49 = arith.constant 0 : index
    %67 = vector.load %arg10[%c0_48, %c0_49] : memref<1x128xf32, #tpu.memory_space<vmem>>, vector<1x128xf32>
    %68 = vector.broadcast %67 : vector<1x128xf32> to vector<2x128xf32>
    %69 = arith.addf %66, %68 : vector<2x128xf32>
    %c0_50 = arith.constant 0 : index
    %c0_51 = arith.constant 0 : index
    %70 = vector.load %arg11[%c0_50, %c0_51] : memref<128x128xf32, #tpu.memory_space<vmem>>, vector<128x128xf32>
    %cst_52 = arith.constant dense<0.000000e+00> : vector<2x128xf32>
    %71 = tpu.matmul %69, %70, %cst_52 {dimension_numbers = #tpu.dot_dimension_numbers<[1], [0], [0], [1], [0, 0, 1, 1], [], []>} : vector<2x128xf32>, vector<128x128xf32>, vector<2x128xf32> -> vector<2x128xf32>
    %72 = arith.mulf %71, %71 : vector<2x128xf32>
    %c0_53 = arith.constant 0 : index
    %c0_54 = arith.constant 0 : index
    %73 = vector.load %arg12[%c0_53, %c0_54] : memref<128x128xf32, #tpu.memory_space<vmem>>, vector<128x128xf32>
    %cst_55 = arith.constant dense<0.000000e+00> : vector<2x128xf32>
    %74 = tpu.matmul %72, %73, %cst_55 {dimension_numbers = #tpu.dot_dimension_numbers<[1], [0], [0], [1], [0, 0, 1, 1], [], []>} : vector<2x128xf32>, vector<128x128xf32>, vector<2x128xf32> -> vector<2x128xf32>
    %c0_56 = arith.constant 0 : index
    %c0_57 = arith.constant 0 : index
    %75 = vector.load %arg13[%c0_56, %c0_57] : memref<1x128xf32, #tpu.memory_space<vmem>>, vector<1x128xf32>
    %76 = vector.broadcast %75 : vector<1x128xf32> to vector<2x128xf32>
    %77 = arith.addf %74, %76 : vector<2x128xf32>
    %78 = arith.divf %72, %77 : vector<2x128xf32>
    %c0_58 = arith.constant 0 : index
    %c0_59 = arith.constant 0 : index
    %79 = vector.load %arg14[%c0_58, %c0_59] : memref<128x512xf32, #tpu.memory_space<vmem>>, vector<128x512xf32>
    %cst_60 = arith.constant dense<0.000000e+00> : vector<2x512xf32>
    %80 = tpu.matmul %69, %79, %cst_60 {dimension_numbers = #tpu.dot_dimension_numbers<[1], [0], [0], [1], [0, 0, 1, 1], [], []>} : vector<2x128xf32>, vector<128x512xf32>, vector<2x512xf32> -> vector<2x512xf32>
    %c0_61 = arith.constant 0 : index
    %c0_62 = arith.constant 0 : index
    %81 = vector.load %arg15[%c0_61, %c0_62] : memref<128x512xf32, #tpu.memory_space<vmem>>, vector<128x512xf32>
    %cst_63 = arith.constant dense<0.000000e+00> : vector<2x512xf32>
    %82 = tpu.matmul %78, %81, %cst_63 {dimension_numbers = #tpu.dot_dimension_numbers<[1], [0], [0], [1], [0, 0, 1, 1], [], []>} : vector<2x128xf32>, vector<128x512xf32>, vector<2x512xf32> -> vector<2x512xf32>
    %83 = arith.mulf %80, %82 : vector<2x512xf32>
    %c0_64 = arith.constant 0 : index
    %c0_65 = arith.constant 0 : index
    %84 = vector.load %arg16[%c0_64, %c0_65] : memref<512x32xf32, #tpu.memory_space<vmem>>, vector<512x32xf32>
    %cst_66 = arith.constant dense<0.000000e+00> : vector<2x32xf32>
    %85 = tpu.matmul %83, %84, %cst_66 {dimension_numbers = #tpu.dot_dimension_numbers<[1], [0], [0], [1], [0, 0, 1, 1], [], []>} : vector<2x512xf32>, vector<512x32xf32>, vector<2x32xf32> -> vector<2x32xf32>
    %c0_67 = arith.constant 0 : index
    %c0_68 = arith.constant 0 : index
    %86 = vector.load %arg17[%c0_67, %c0_68] : memref<1x32xf32, #tpu.memory_space<vmem>>, vector<1x32xf32>
    %87 = vector.broadcast %86 : vector<1x32xf32> to vector<2x32xf32>
    %88 = arith.addf %85, %87 : vector<2x32xf32>
    %cst_69 = arith.constant 0.000000e+00 : f32
    %89 = vector.broadcast %cst_69 : f32 to vector<2x32xf32>
    %90 = arith.cmpf ogt, %88, %89 : vector<2x32xf32>
    %cst_70 = arith.constant 0.00999999977 : f32
    %91 = vector.broadcast %cst_70 : f32 to vector<2x32xf32>
    %92 = arith.mulf %91, %88 : vector<2x32xf32>
    %93 = arith.select %90, %88, %92 : vector<2x32xi1>, vector<2x32xf32>
    %c0_71 = arith.constant 0 : index
    %c0_72 = arith.constant 0 : index
    %94 = vector.load %arg18[%c0_71, %c0_72] : memref<32x256xf32, #tpu.memory_space<vmem>>, vector<32x256xf32>
    %cst_73 = arith.constant dense<0.000000e+00> : vector<2x256xf32>
    %95 = tpu.matmul %93, %94, %cst_73 {dimension_numbers = #tpu.dot_dimension_numbers<[1], [0], [0], [1], [0, 0, 1, 1], [], []>} : vector<2x32xf32>, vector<32x256xf32>, vector<2x256xf32> -> vector<2x256xf32>
    %c0_74 = arith.constant 0 : index
    %c0_75 = arith.constant 0 : index
    %96 = vector.load %arg19[%c0_74, %c0_75] : memref<1x256xf32, #tpu.memory_space<vmem>>, vector<1x256xf32>
    %97 = vector.broadcast %96 : vector<1x256xf32> to vector<2x256xf32>
    %98 = arith.addf %95, %97 : vector<2x256xf32>
    %cst_76 = arith.constant 0.000000e+00 : f32
    %99 = vector.broadcast %cst_76 : f32 to vector<2x256xf32>
    %100 = arith.cmpf ogt, %98, %99 : vector<2x256xf32>
    %cst_77 = arith.constant 0.00999999977 : f32
    %101 = vector.broadcast %cst_77 : f32 to vector<2x256xf32>
    %102 = arith.mulf %101, %98 : vector<2x256xf32>
    %103 = arith.select %100, %98, %102 : vector<2x256xi1>, vector<2x256xf32>
    %c0_78 = arith.constant 0 : index
    %c0_79 = arith.constant 0 : index
    %104 = vector.load %arg20[%c0_78, %c0_79] : memref<256x32xf32, #tpu.memory_space<vmem>>, vector<256x32xf32>
    %cst_80 = arith.constant dense<0.000000e+00> : vector<2x32xf32>
    %105 = tpu.matmul %103, %104, %cst_80 {dimension_numbers = #tpu.dot_dimension_numbers<[1], [0], [0], [1], [0, 0, 1, 1], [], []>} : vector<2x256xf32>, vector<256x32xf32>, vector<2x32xf32> -> vector<2x32xf32>
    %c0_81 = arith.constant 0 : index
    %c0_82 = arith.constant 0 : index
    %106 = vector.load %arg21[%c0_81, %c0_82] : memref<1x32xf32, #tpu.memory_space<vmem>>, vector<1x32xf32>
    %107 = vector.broadcast %106 : vector<1x32xf32> to vector<2x32xf32>
    %108 = arith.addf %105, %107 : vector<2x32xf32>
    %cst_83 = arith.constant 0.000000e+00 : f32
    %109 = vector.broadcast %cst_83 : f32 to vector<2x32xf32>
    %110 = arith.cmpf ogt, %108, %109 : vector<2x32xf32>
    %cst_84 = arith.constant 0.00999999977 : f32
    %111 = vector.broadcast %cst_84 : f32 to vector<2x32xf32>
    %112 = arith.mulf %111, %108 : vector<2x32xf32>
    %113 = arith.select %110, %108, %112 : vector<2x32xi1>, vector<2x32xf32>
    %c0_85 = arith.constant 0 : index
    %c0_86 = arith.constant 0 : index
    %114 = vector.load %arg22[%c0_85, %c0_86] : memref<32x128xf32, #tpu.memory_space<vmem>>, vector<32x128xf32>
    %cst_87 = arith.constant dense<0.000000e+00> : vector<2x128xf32>
    %115 = tpu.matmul %113, %114, %cst_87 {dimension_numbers = #tpu.dot_dimension_numbers<[1], [0], [0], [1], [0, 0, 1, 1], [], []>} : vector<2x32xf32>, vector<32x128xf32>, vector<2x128xf32> -> vector<2x128xf32>
    %c0_88 = arith.constant 0 : index
    %c0_89 = arith.constant 0 : index
    %116 = vector.load %arg23[%c0_88, %c0_89] : memref<1x128xf32, #tpu.memory_space<vmem>>, vector<1x128xf32>
    %117 = vector.broadcast %116 : vector<1x128xf32> to vector<2x128xf32>
    %118 = arith.addf %115, %117 : vector<2x128xf32>
    %119 = arith.addf %118, %78 : vector<2x128xf32>
    %c0_90 = arith.constant 0 : index
    %c0_91 = arith.constant 0 : index
    %120 = vector.load %arg24[%c0_90, %c0_91] : memref<2x128xf32, #tpu.memory_space<vmem>>, vector<2x128xf32>
    tpu.vector_store %arg24[%c0_90, %c0_91], %119 {strides = array<i32>} : memref<2x128xf32, #tpu.memory_space<vmem>>, vector<2x128xf32>,
    return
  }
}

</mosaic_0001>

<bundles_post_ra>
// kernel: quadratic_bn_forward.1
= control target key start
LH: loop header
LB: loop body
LE: loop exit
PB: predicated region body
PF: predicated region fallthrough
CT: control target
= control target key end

     0   :  { %s4636_s0 = inlined_call_operand.vmem [shape: f32[2,128], index: 0, kind: input, shape index: {}]   ;;  %s4637_s1 = inlined_call_operand.hbm [shape: f32[2,128,128], index: 1, kind: input, shape index: {}]   ;;  %s4638_s2 = inlined_call_operand.hbm [shape: f32[2,1,128], index: 2, kind: input, shape index: {}]   ;;  %s4639_s3 = inlined_call_operand.hbm [shape: f32[2,128,128], index: 3, kind: input, shape index: {}]   ;;  %s4640_s4 = inlined_call_operand.hbm [shape: f32[2,1,128], index: 4, kind: input, shape index: {}]   ;;  %s4641_s5 = inlined_call_operand.vmem [shape: f32[128,32], index: 5, kind: input, shape index: {}]   ;;  %s4642_s6 = inlined_call_operand.hbm [shape: f32[1,32], index: 6, kind: input, shape index: {}]   ;;  %s4643_s7 = inlined_call_operand.hbm [shape: f32[32,32], index: 7, kind: input, shape index: {}]   ;;  %s4644_s8 = inlined_call_operand.hbm [shape: f32[1,32], index: 8, kind: input, shape index: {}]   ;;  %s4645_s9 = inlined_call_operand.hbm [shape: f32[32,128], index: 9, kind: input, shape index: {}]   ;;  %s4646_s10 = inlined_call_operand.hbm [shape: f32[1,128], index: 10, kind: input, shape index: {}]   ;;  %s4647_s11 = inlined_call_operand.hbm [shape: f32[128,128], index: 11, kind: input, shape index: {}]   ;;  %s4648_s12 = inlined_call_operand.hbm [shape: f32[128,128], index: 12, kind: input, shape index: {}]   ;;  %s4649_s13 = inlined_call_operand.hbm [shape: f32[1,128], index: 13, kind: input, shape index: {}]   ;;  %s4650_s14 = inlined_call_operand.vmem [shape: f32[128,512], index: 14, kind: input, shape index: {}]   ;;  %s4651_s15 = inlined_call_operand.vmem [shape: f32[128,512], index: 15, kind: input, shape index: {}]   ;;  %s4652_s16 = inlined_call_operand.vmem [shape: f32[512,32], index: 16, kind: input, shape index: {}]   ;;  %s4653_s17 = inlined_call_operand.hbm [shape: f32[1,32], index: 17, kind: input, shape index: {}]   ;;  %s4654_s18 = inlined_call_operand.hbm [shape: f32[32,256], index: 18, kind: input, shape index: {}]   ;;  %s4655_s19 = inlined_call_operand.vmem [shape: f32[1,256], index: 19, kind: input, shape index: {}]   ;;  %s4656_s20 = inlined_call_operand.vmem [shape: f32[256,32], index: 20, kind: input, shape index: {}]   ;;  %s4657_s21 = inlined_call_operand.hbm [shape: f32[1,32], index: 21, kind: input, shape index: {}]   ;;  %s4658_s22 = inlined_call_operand.vmem [shape: f32[32,128], index: 22, kind: input, shape index: {}]   ;;  %s4659_s23 = inlined_call_operand.hbm [shape: f32[1,128], index: 23, kind: input, shape index: {}]   ;;  %s4660_s24 = inlined_call_operand.vmem [shape: f32[2,128], index: 24, kind: output, shape index: {}]  }
   0x1   :  { %4670 = sst [smem:[#allocation36_spill]] %s4636_s0 }
   0x2   :  { %4671 = sst [smem:[#allocation37_spill]] %s4637_s1 }
   0x3   :  { %4672 = sst [smem:[#allocation38_spill]] %s4638_s2 }
   0x4   :  { %4673 = sst [smem:[#allocation39_spill]] %s4639_s3 }
   0x5   :  { %4674 = sst [smem:[#allocation40_spill]] %s4640_s4 }
   0x6   :  { %4675 = sst [smem:[#allocation41_spill]] %s4641_s5 }
   0x7   :  { %4676 = sst [smem:[#allocation42_spill]] %s4642_s6 }
   0x8   :  { %4677 = sst [smem:[#allocation43_spill]] %s4643_s7 }
   0x9   :  { %4678 = sst [smem:[#allocation44_spill]] %s4644_s8 }
   0xa   :  { %4679 = sst [smem:[#allocation45_spill]] %s4655_s19 }
   0xb   :  { %4680 = sst [smem:[#allocation46_spill]] %s4658_s22 }
   0xc   :  { %4681 = sst [smem:[#allocation47_spill]] %s4660_s24 }
   0xd   :  { %29 = vsyncpa [#allocation3], 0 }
   0xe   :  { %30 = vsyncpa [#allocation5], 0 }
   0xf   :  { %31 = vsyncpa [#allocation8], 0 }
  0x10   :  { %32 = vsyncpa [#allocation11], 0 }
  0x11   :  { %33 = vsyncpa [#allocation14], 0 }
  0x12   :  { %34 = vsyncpa [#allocation17], 0 }
  0x13   :  { %35 = vsyncpa [#allocation20], 0 }
  0x14   :  { %36 = vsyncpa [#allocation23], 0 }
  0x15   :  { %37 = vsyncpa [#allocation26], 0  ;;  %s3406_s5 = smov [#allocation4]   ;;  %s4682_s6 = sld [smem:[#allocation38_spill]] }
  0x16   :  { %s57_s26 = sshll.u32 %s3406_s5, 4  ;;  %s58_s26 = int_to_ptr.vmem [resolvable:$true] %s57_s26 }
  0x1b   :  { %s3036_s2 = scalar_lea.hbm %s4682_s6, 32 }
  0x1c   :  { %p3037_p0 = scmp.ne.s32.totalorder %s4682_s6, %s3036_s2  ;;  %p3040_p1 = scmp.lt.u32.totalorder %s3036_s2, %s4682_s6 }
  0x1e   :  { %p3042_p2 = pnand %p3040_p1, %p3037_p0 }
  0x20   :  { %3045 = shalt.err (!%p3042_p2)
}
  0x21   :  { %s3046_s3 = scalar_lea.vmem %s58_s26, 32  ;;  %p3051_p4 = scmp.lt.s32.totalorder %s58_s26, %s58_s26 }
  0x22   :  { %p3047_p3 = scmp.ne.s32.totalorder %s58_s26, %s3046_s3  ;;  %p3052_p5 = scmp.lt.s32.totalorder %s3046_s3, %s3046_s3 }
  0x24   :  { %p3053_p6 = por %p3052_p5, %p3051_p4 }
  0x26   :  { %p3054_p7 = pnand %p3053_p6, %p3047_p3 }
  0x28   :  { %3057 = shalt.err (!%p3054_p7)
}
  0x29   :  { %s3407_s25 = smov 16   ;;  %s3408_s8 = smov 1  }
  0x2a   :  { %63 = dma.hbm_to_vmem [thread:$0]  %s4682_s6, 32, %s58_s26, [#allocation5], %s3407_s25, %s3407_s25, %s3408_s8  }
  0x2b   :  { %s3409_s5 = smov [#allocation7]   ;;  %s4683_s29 = sld [smem:[#allocation40_spill]] }
  0x2c   :  { %s81_s27 = sshll.u32 %s3409_s5, 4  ;;  %s82_s27 = int_to_ptr.vmem [resolvable:$true] %s81_s27 }
  0x31   :  { %s3058_s0 = scalar_lea.hbm %s4683_s29, 32 }
  0x32   :  { %p3059_p8 = scmp.ne.s32.totalorder %s4683_s29, %s3058_s0  ;;  %p3062_p9 = scmp.lt.u32.totalorder %s3058_s0, %s4683_s29 }
  0x34   :  { %p3064_p10 = pnand %p3062_p9, %p3059_p8 }
  0x36   :  { %3067 = shalt.err (!%p3064_p10)
}
  0x37   :  { %s3068_s22 = scalar_lea.vmem %s82_s27, 32  ;;  %p3073_p12 = scmp.lt.s32.totalorder %s82_s27, %s82_s27 }
  0x38   :  { %p3069_p11 = scmp.ne.s32.totalorder %s82_s27, %s3068_s22  ;;  %p3074_p13 = scmp.lt.s32.totalorder %s3068_s22, %s3068_s22 }
  0x3a   :  { %p3075_p0 = por %p3074_p13, %p3073_p12 }
  0x3c   :  { %p3076_p1 = pnand %p3075_p0, %p3069_p11 }
  0x3e   :  { %3079 = shalt.err (!%p3076_p1)
}
  0x3f   :  { %87 = dma.hbm_to_vmem [thread:$0]  %s4683_s29, 32, %s82_s27, [#allocation8], %s3407_s25, %s3407_s25, %s3408_s8  }
  0x40   :  { %s3410_s4 = smov [#allocation10]   ;;  %s3411_s5 = smov [#allocation13]  }
  0x41   :  { %s105_s1 = sshll.u32 %s3410_s4, 4  ;;  %s127_s24 = sshll.u32 %s3411_s5, 4  ;;  %s106_s1 = int_to_ptr.vmem [resolvable:$true] %s105_s1  ;;  %s3583_s24 = int_to_ptr.vmem [resolvable:$true] %s127_s24 }
  0x42   :  { %s4684_s0 = sld [smem:[#allocation43_spill]] }
  0x48   :  { %s3080_s22 = scalar_lea.hbm %s4684_s0, 512 }
  0x49   :  { %p3081_p2 = scmp.ne.s32.totalorder %s4684_s0, %s3080_s22  ;;  %p3084_p3 = scmp.lt.u32.totalorder %s3080_s22, %s4684_s0 }
  0x4b   :  { %p3086_p4 = pnand %p3084_p3, %p3081_p2 }
  0x4d   :  { %3089 = shalt.err (!%p3086_p4)
}
  0x4e   :  { %s3090_s8 = scalar_lea.vmem %s106_s1, 512  ;;  %p3095_p6 = scmp.lt.s32.totalorder %s106_s1, %s106_s1 }
  0x4f   :  { %p3091_p5 = scmp.ne.s32.totalorder %s106_s1, %s3090_s8  ;;  %p3096_p7 = scmp.lt.s32.totalorder %s3090_s8, %s3090_s8 }
  0x51   :  { %p3097_p8 = por %p3096_p7, %p3095_p6 }
  0x53   :  { %p3098_p9 = pnand %p3097_p8, %p3091_p5 }
  0x55   :  { %3101 = shalt.err (!%p3098_p9)
}
  0x56   :  { %s3412_s27 = smov 128   ;;  %s3413_s29 = smov 8  }
  0x57   :  { %111 = dma.hbm_to_vmem [thread:$0]  %s4684_s0, 512, %s106_s1, [#allocation11], %s3412_s27, %s3412_s27, %s3413_s29  }
  0x58   :  { %s3102_s5 = scalar_lea.hbm %s4645_s9, 512 }
  0x59   :  { %p3103_p10 = scmp.ne.s32.totalorder %s4645_s9, %s3102_s5  ;;  %p3106_p11 = scmp.lt.u32.totalorder %s3102_s5, %s4645_s9 }
  0x5b   :  { %p3108_p12 = pnand %p3106_p11, %p3103_p10 }
  0x5d   :  { %3111 = shalt.err (!%p3108_p12)
}
  0x5e   :  { %s3112_s30 = scalar_lea.vmem %s3583_s24, 512  ;;  %p3117_p0 = scmp.lt.s32.totalorder %s3583_s24, %s3583_s24 }
  0x5f   :  { %p3113_p13 = scmp.ne.s32.totalorder %s3583_s24, %s3112_s30  ;;  %p3118_p1 = scmp.lt.s32.totalorder %s3112_s30, %s3112_s30 }
  0x61   :  { %p3119_p2 = por %p3118_p1, %p3117_p0 }
  0x63   :  { %p3120_p3 = pnand %p3119_p2, %p3113_p13 }
  0x65   :  { %3123 = shalt.err (!%p3120_p3)
}
  0x66   :  { %133 = dma.hbm_to_vmem [thread:$0]  %s4645_s9, 512, %s3583_s24, [#allocation14], %s3412_s27, %s3412_s27, %s3413_s29  }
  0x67   :  { %s3414_s3 = smov [#allocation16]   ;;  %s3415_s26 = smov [#allocation19]  }
  0x68   :  { %s149_s8 = sshll.u32 %s3414_s3, 4  ;;  %s174_s6 = sshll.u32 %s3415_s26, 4  ;;  %s150_s8 = int_to_ptr.vmem [resolvable:$true] %s149_s8  ;;  %s175_s6 = int_to_ptr.vmem [resolvable:$true] %s174_s6 }
  0x69   :  { %s3124_s5 = scalar_lea.hbm %s4647_s11, 2048 }
  0x6a   :  { %p3125_p4 = scmp.ne.s32.totalorder %s4647_s11, %s3124_s5  ;;  %p3128_p5 = scmp.lt.u32.totalorder %s3124_s5, %s4647_s11 }
  0x6c   :  { %p3130_p6 = pnand %p3128_p5, %p3125_p4 }
  0x6e   :  { %3133 = shalt.err (!%p3130_p6)
}
  0x6f   :  { %s3134_s9 = scalar_lea.vmem %s150_s8, 2048  ;;  %p3139_p8 = scmp.lt.s32.totalorder %s150_s8, %s150_s8 }
  0x70   :  { %p3135_p7 = scmp.ne.s32.totalorder %s150_s8, %s3134_s9  ;;  %p3140_p9 = scmp.lt.s32.totalorder %s3134_s9, %s3134_s9 }
  0x72   :  { %p3141_p10 = por %p3140_p9, %p3139_p8 }
  0x74   :  { %p3142_p11 = pnand %p3141_p10, %p3135_p7 }
  0x76   :  { %3145 = shalt.err (!%p3142_p11)
}
  0x77   :  { %155 = dma.hbm_to_vmem [thread:$0]  %s4647_s11, 2048, %s150_s8, [#allocation17], %s3412_s27, %s3412_s27, %s3413_s29  }
  0x78   :  { %s3146_s3 = scalar_lea.hbm %s4649_s13, 16 }
  0x79   :  { %p3147_p12 = scmp.ne.s32.totalorder %s4649_s13, %s3146_s3  ;;  %p3150_p13 = scmp.lt.u32.totalorder %s3146_s3, %s4649_s13 }
  0x7b   :  { %p3152_p0 = pnand %p3150_p13, %p3147_p12 }
  0x7d   :  { %3155 = shalt.err (!%p3152_p0)
}
  0x7e   :  { %s3156_s28 = scalar_lea.vmem %s175_s6, 16  ;;  %s3160_s2 = scalar_lea.vmem %s175_s6, 32 }
  0x7f   :  { %p3157_p1 = scmp.ne.s32.totalorder %s175_s6, %s3156_s28  ;;  %p3161_p2 = scmp.lt.s32.totalorder %s175_s6, %s175_s6 }
  0x80   :  { %p3162_p3 = scmp.lt.s32.totalorder %s3160_s2, %s3156_s28 }
  0x82   :  { %p3163_p4 = por %p3162_p3, %p3161_p2 }
  0x84   :  { %p3164_p5 = pnand %p3163_p4, %p3157_p1 }
  0x86   :  { %3167 = shalt.err (!%p3164_p5)
}
  0x87   :  { %177 = dma.hbm_to_vmem [thread:$0]  %s4649_s13, 16, %s175_s6, [#allocation20]  }
  0x88   :  { %s3416_s22 = smov [#allocation22]   ;;  %s3417_s9 = smov [#allocation2]  }
  0x89   :  { %s199_s7 = sshll.u32 %s3416_s22, 4  ;;  %s45_s24 = sshll.u32 %s3417_s9, 4  ;;  %s200_s7 = int_to_ptr.vmem [resolvable:$true] %s199_s7  ;;  %s46_s24 = int_to_ptr.vmem [resolvable:$true] %s45_s24 }
  0x8a   :  { %s3168_s0 = scalar_lea.hbm %s4654_s18, 1024 }
  0x8b   :  { %p3169_p6 = scmp.ne.s32.totalorder %s4654_s18, %s3168_s0  ;;  %p3172_p7 = scmp.lt.u32.totalorder %s3168_s0, %s4654_s18 }
  0x8d   :  { %p3174_p8 = pnand %p3172_p7, %p3169_p6 }
  0x8f   :  { %3177 = shalt.err (!%p3174_p8)
}
  0x90   :  { %s3178_s13 = scalar_lea.vmem %s200_s7, 1024  ;;  %p3183_p10 = scmp.lt.s32.totalorder %s200_s7, %s200_s7 }
  0x91   :  { %p3179_p9 = scmp.ne.s32.totalorder %s200_s7, %s3178_s13  ;;  %p3184_p11 = scmp.lt.s32.totalorder %s3178_s13, %s3178_s13 }
  0x93   :  { %p3185_p12 = por %p3184_p11, %p3183_p10 }
  0x95   :  { %p3186_p13 = pnand %p3185_p12, %p3179_p9 }
  0x97   :  { %3189 = shalt.err (!%p3186_p13)
}
  0x98   :  { %s3418_s6 = smov 256   ;;  %s4685_s8 = sld [smem:[#allocation37_spill]] }
  0x99   :  { %205 = dma.hbm_to_vmem [thread:$0]  %s4654_s18, 1024, %s200_s7, [#allocation23], %s3418_s6, %s3418_s6, %s3407_s25  }
  0x9e   :  { %s3190_s22 = scalar_lea.hbm %s4685_s8, 4096 }
  0x9f   :  { %p3191_p0 = scmp.ne.s32.totalorder %s4685_s8, %s3190_s22  ;;  %p3194_p1 = scmp.lt.u32.totalorder %s3190_s22, %s4685_s8 }
  0xa1   :  { %p3196_p2 = pnand %p3194_p1, %p3191_p0 }
  0xa3   :  { %3199 = shalt.err (!%p3196_p2)
}
  0xa4   :  { %s3200_s3 = scalar_lea.vmem %s46_s24, 4096  ;;  %p3205_p4 = scmp.lt.s32.totalorder %s46_s24, %s46_s24 }
  0xa5   :  { %p3201_p3 = scmp.ne.s32.totalorder %s46_s24, %s3200_s3  ;;  %p3206_p5 = scmp.lt.s32.totalorder %s3200_s3, %s3200_s3 }
  0xa7   :  { %p3207_p6 = por %p3206_p5, %p3205_p4 }
  0xa9   :  { %p3208_p7 = pnand %p3207_p6, %p3201_p3 }
  0xab   :  { %3211 = shalt.err (!%p3208_p7)
}
  0xac   :  { %51 = dma.hbm_to_vmem [thread:$0]  %s4685_s8, 4096, %s46_s24, [#allocation3], %s3412_s27, %s3412_s27, %s3413_s29  }
  0xad   :  { %s3419_s7 = smov [#allocation6]   ;;  %s3420_s19 = smov [#allocation9]  }
  0xae   :  { %s69_s26 = sshll.u32 %s3419_s7, 4  ;;  %s96_s4 = sshll.u32 %s3420_s19, 4  ;;  %s70_s26 = int_to_ptr.vmem [resolvable:$true] %s69_s26  ;;  %s97_s4 = int_to_ptr.vmem [resolvable:$true] %s96_s4 }
  0xaf   :  { %s4686_s5 = sld [smem:[#allocation39_spill]] }
  0xb5   :  { %s3212_s28 = scalar_lea.hbm %s4686_s5, 4096 }
  0xb6   :  { %p3213_p8 = scmp.ne.s32.totalorder %s4686_s5, %s3212_s28  ;;  %p3216_p9 = scmp.lt.u32.totalorder %s3212_s28, %s4686_s5 }
  0xb8   :  { %p3218_p10 = pnand %p3216_p9, %p3213_p8 }
  0xba   :  { %3221 = shalt.err (!%p3218_p10)
}
  0xbb   :  { %s3222_s24 = scalar_lea.vmem %s70_s26, 4096  ;;  %p3227_p12 = scmp.lt.s32.totalorder %s70_s26, %s70_s26 }
  0xbc   :  { %p3223_p11 = scmp.ne.s32.totalorder %s70_s26, %s3222_s24  ;;  %p3228_p13 = scmp.lt.s32.totalorder %s3222_s24, %s3222_s24 }
  0xbe   :  { %p3229_p0 = por %p3228_p13, %p3227_p12 }
  0xc0   :  { %p3230_p1 = pnand %p3229_p0, %p3223_p11 }
  0xc2   :  { %3233 = shalt.err (!%p3230_p1)
}
  0xc3   :  { %75 = dma.hbm_to_vmem [thread:$0]  %s4686_s5, 4096, %s70_s26, [#allocation5], %s3412_s27, %s3412_s27, %s3413_s29  }
  0xc4   :  { %s4687_s3 = sld [smem:[#allocation42_spill]] }
  0xca   :  { %s3234_s18 = scalar_lea.hbm %s4687_s3, 16 }
  0xcb   :  { %p3235_p2 = scmp.ne.s32.totalorder %s4687_s3, %s3234_s18  ;;  %p3238_p3 = scmp.lt.u32.totalorder %s3234_s18, %s4687_s3 }
  0xcd   :  { %p3240_p4 = pnand %p3238_p3, %p3235_p2 }
  0xcf   :  { %3243 = shalt.err (!%p3240_p4)
}
  0xd0   :  { %s3244_s6 = scalar_lea.vmem %s97_s4, 16  ;;  %s3248_s28 = scalar_lea.vmem %s97_s4, 32 }
  0xd1   :  { %p3245_p5 = scmp.ne.s32.totalorder %s97_s4, %s3244_s6  ;;  %p3249_p6 = scmp.lt.s32.totalorder %s97_s4, %s97_s4 }
  0xd2   :  { %p3250_p7 = scmp.lt.s32.totalorder %s3248_s28, %s3244_s6 }
  0xd4   :  { %p3251_p8 = por %p3250_p7, %p3249_p6 }
  0xd6   :  { %p3252_p9 = pnand %p3251_p8, %p3245_p5 }
  0xd8   :  { %3255 = shalt.err (!%p3252_p9)
}
  0xd9   :  { %99 = dma.hbm_to_vmem [thread:$0]  %s4687_s3, 16, %s97_s4, [#allocation8]  }
  0xda   :  { %s3421_s2 = smov [#allocation12]   ;;  %s3422_s22 = smov [#allocation15]  }
  0xdb   :  { %s118_s11 = sshll.u32 %s3421_s2, 4  ;;  %s140_s9 = sshll.u32 %s3422_s22, 4  ;;  %s119_s11 = int_to_ptr.vmem [resolvable:$true] %s118_s11  ;;  %s141_s9 = int_to_ptr.vmem [resolvable:$true] %s140_s9 }
  0xdc   :  { %s4688_s30 = sld [smem:[#allocation44_spill]] }
  0xe2   :  { %s3256_s1 = scalar_lea.hbm %s4688_s30, 16 }
  0xe3   :  { %p3257_p10 = scmp.ne.s32.totalorder %s4688_s30, %s3256_s1  ;;  %p3260_p11 = scmp.lt.u32.totalorder %s3256_s1, %s4688_s30 }
  0xe5   :  { %p3262_p12 = pnand %p3260_p11, %p3257_p10 }
  0xe7   :  { %3265 = shalt.err (!%p3262_p12)
}
  0xe8   :  { %s3266_s4 = scalar_lea.vmem %s119_s11, 16  ;;  %s3270_s3 = scalar_lea.vmem %s119_s11, 32 }
  0xe9   :  { %p3267_p13 = scmp.ne.s32.totalorder %s119_s11, %s3266_s4  ;;  %p3271_p0 = scmp.lt.s32.totalorder %s119_s11, %s119_s11 }
  0xea   :  { %p3272_p1 = scmp.lt.s32.totalorder %s3270_s3, %s3266_s4 }
  0xec   :  { %p3273_p2 = por %p3272_p1, %p3271_p0 }
  0xee   :  { %p3274_p3 = pnand %p3273_p2, %p3267_p13 }
  0xf0   :  { %3277 = shalt.err (!%p3274_p3)
}
  0xf1   :  { %121 = dma.hbm_to_vmem [thread:$0]  %s4688_s30, 16, %s119_s11, [#allocation11]  }
  0xf2   :  { %s3278_s26 = scalar_lea.hbm %s4646_s10, 16 }
  0xf3   :  { %p3279_p4 = scmp.ne.s32.totalorder %s4646_s10, %s3278_s26  ;;  %p3282_p5 = scmp.lt.u32.totalorder %s3278_s26, %s4646_s10 }
  0xf5   :  { %p3284_p6 = pnand %p3282_p5, %p3279_p4 }
  0xf7   :  { %3287 = shalt.err (!%p3284_p6)
}
  0xf8   :  { %s3288_s8 = scalar_lea.vmem %s141_s9, 16  ;;  %s3292_s1 = scalar_lea.vmem %s141_s9, 32 }
  0xf9   :  { %p3289_p7 = scmp.ne.s32.totalorder %s141_s9, %s3288_s8  ;;  %p3293_p8 = scmp.lt.s32.totalorder %s141_s9, %s141_s9 }
  0xfa   :  { %p3294_p9 = scmp.lt.s32.totalorder %s3292_s1, %s3288_s8 }
  0xfc   :  { %p3295_p10 = por %p3294_p9, %p3293_p8 }
  0xfe   :  { %p3296_p11 = pnand %p3295_p10, %p3289_p7 }
 0x100   :  { %3299 = shalt.err (!%p3296_p11)
}
 0x101   :  { %143 = dma.hbm_to_vmem [thread:$0]  %s4646_s10, 16, %s141_s9, [#allocation14]  }
 0x102   :  { %s3423_s0 = smov [#allocation18]   ;;  %s3424_s25 = smov [#allocation21]  }
 0x103   :  { %s161_s18 = sshll.u32 %s3423_s0, 4  ;;  %s190_s7 = sshll.u32 %s3424_s25, 4  ;;  %s162_s18 = int_to_ptr.vmem [resolvable:$true] %s161_s18  ;;  %s191_s7 = int_to_ptr.vmem [resolvable:$true] %s190_s7 }
 0x104   :  { %s3300_s19 = scalar_lea.hbm %s4648_s12, 2048 }
 0x105   :  { %p3301_p12 = scmp.ne.s32.totalorder %s4648_s12, %s3300_s19  ;;  %p3304_p13 = scmp.lt.u32.totalorder %s3300_s19, %s4648_s12 }
 0x107   :  { %p3306_p0 = pnand %p3304_p13, %p3301_p12 }
 0x109   :  { %3309 = shalt.err (!%p3306_p0)
}
 0x10a   :  { %s3310_s10 = scalar_lea.vmem %s162_s18, 2048  ;;  %p3315_p2 = scmp.lt.s32.totalorder %s162_s18, %s162_s18 }
 0x10b   :  { %p3311_p1 = scmp.ne.s32.totalorder %s162_s18, %s3310_s10  ;;  %p3316_p3 = scmp.lt.s32.totalorder %s3310_s10, %s3310_s10 }
 0x10d   :  { %p3317_p4 = por %p3316_p3, %p3315_p2 }
 0x10f   :  { %p3318_p5 = pnand %p3317_p4, %p3311_p1 }
 0x111   :  { %3321 = shalt.err (!%p3318_p5)
}
 0x112   :  { %167 = dma.hbm_to_vmem [thread:$0]  %s4648_s12, 2048, %s162_s18, [#allocation17], %s3412_s27, %s3412_s27, %s3413_s29  }
 0x113   :  { %s3322_s24 = scalar_lea.hbm %s4653_s17, 16 }
 0x114   :  { %p3323_p6 = scmp.ne.s32.totalorder %s4653_s17, %s3322_s24  ;;  %p3326_p7 = scmp.lt.u32.totalorder %s3322_s24, %s4653_s17 }
 0x116   :  { %p3328_p8 = pnand %p3326_p7, %p3323_p6 }
 0x118   :  { %3331 = shalt.err (!%p3328_p8)
}
 0x119   :  { %s3332_s0 = scalar_lea.vmem %s191_s7, 16  ;;  %s3336_s25 = scalar_lea.vmem %s191_s7, 32 }
 0x11a   :  { %p3333_p9 = scmp.ne.s32.totalorder %s191_s7, %s3332_s0  ;;  %p3337_p10 = scmp.lt.s32.totalorder %s191_s7, %s191_s7 }
 0x11b   :  { %p3338_p11 = scmp.lt.s32.totalorder %s3336_s25, %s3332_s0 }
 0x11d   :  { %p3339_p12 = por %p3338_p11, %p3337_p10 }
 0x11f   :  { %p3340_p13 = pnand %p3339_p12, %p3333_p9 }
 0x121   :  { %3343 = shalt.err (!%p3340_p13)
}
 0x122   :  { %193 = dma.hbm_to_vmem [thread:$0]  %s4653_s17, 16, %s191_s7, [#allocation20]  }
 0x123   :  { %s3425_s29 = smov [#allocation24]   ;;  %s3426_s4 = smov [#allocation25]  }
 0x124   :  { %s216_s18 = sshll.u32 %s3425_s29, 4  ;;  %s228_s3 = sshll.u32 %s3426_s4, 4  ;;  %s217_s18 = int_to_ptr.vmem [resolvable:$true] %s216_s18  ;;  %s229_s3 = int_to_ptr.vmem [resolvable:$true] %s228_s3 }
 0x125   :  { %s3344_s6 = scalar_lea.hbm %s4657_s21, 16 }
 0x126   :  { %p3345_p0 = scmp.ne.s32.totalorder %s4657_s21, %s3344_s6  ;;  %p3348_p1 = scmp.lt.u32.totalorder %s3344_s6, %s4657_s21 }
 0x128   :  { %p3350_p2 = pnand %p3348_p1, %p3345_p0 }
 0x12a   :  { %3353 = shalt.err (!%p3350_p2)
}
 0x12b   :  { %s3354_s17 = scalar_lea.vmem %s217_s18, 16  ;;  %s3358_s7 = scalar_lea.vmem %s217_s18, 32 }
 0x12c   :  { %p3355_p3 = scmp.ne.s32.totalorder %s217_s18, %s3354_s17  ;;  %p3359_p4 = scmp.lt.s32.totalorder %s217_s18, %s217_s18 }
 0x12d   :  { %p3360_p5 = scmp.lt.s32.totalorder %s3358_s7, %s3354_s17 }
 0x12f   :  { %p3361_p6 = por %p3360_p5, %p3359_p4 }
 0x131   :  { %p3362_p7 = pnand %p3361_p6, %p3355_p3 }
 0x133   :  { %3365 = shalt.err (!%p3362_p7)
}
 0x134   :  { %219 = dma.hbm_to_vmem [thread:$0]  %s4657_s21, 16, %s217_s18, [#allocation23]  }
 0x135   :  { %s3366_s8 = scalar_lea.hbm %s4659_s23, 16 }
 0x136   :  { %p3367_p8 = scmp.ne.s32.totalorder %s4659_s23, %s3366_s8  ;;  %p3370_p9 = scmp.lt.u32.totalorder %s3366_s8, %s4659_s23 }
 0x138   :  { %p3372_p10 = pnand %p3370_p9, %p3367_p8 }
 0x13a   :  { %3375 = shalt.err (!%p3372_p10)
}
 0x13b   :  { %s3376_s25 = scalar_lea.vmem %s229_s3, 16  ;;  %s3380_s12 = scalar_lea.vmem %s229_s3, 32 }
 0x13c   :  { %p3377_p11 = scmp.ne.s32.totalorder %s229_s3, %s3376_s25  ;;  %p3381_p12 = scmp.lt.s32.totalorder %s229_s3, %s229_s3 }
 0x13d   :  { %p3382_p13 = scmp.lt.s32.totalorder %s3380_s12, %s3376_s25 }
 0x13f   :  { %p3383_p0 = por %p3382_p13, %p3381_p12 }
 0x141   :  { %p3384_p1 = pnand %p3383_p0, %p3377_p11 }
 0x143   :  { %3387 = shalt.err (!%p3384_p1)
}
 0x144   :  { %231 = dma.hbm_to_vmem [thread:$0]  %s4659_s23, 16, %s229_s3, [#allocation26]  }
 0x145   :  { %3388 = dma.done.wait [#allocation3], 4096  }
 0x146   :  { %3389 = vsyncadd [#allocation3], 4294963200 }
 0x147   :  { %3390 = dma.done.wait [#allocation5], 4128  }
 0x148   :  { %3391 = vsyncadd [#allocation5], 4294963168 }
 0x149   :  { %3392 = dma.done.wait [#allocation8], 48  }
 0x14a   :  { %3393 = vsyncadd [#allocation8], 4294967248 }
 0x14b   :  { %3394 = dma.done.wait [#allocation11], 528  }
 0x14c   :  { %3395 = vsyncadd [#allocation11], 4294966768 }
 0x14d   :  { %3396 = dma.done.wait [#allocation14], 528  }
 0x14e   :  { %3397 = vsyncadd [#allocation14], 4294966768 }
 0x14f   :  { %3398 = dma.done.wait [#allocation17], 4096  }
 0x150   :  { %3399 = vsyncadd [#allocation17], 4294963200 }
 0x151   :  { %3400 = dma.done.wait [#allocation20], 32  }
 0x152   :  { %3401 = vsyncadd [#allocation20], 4294967264 }
 0x153   :  { %3402 = dma.done.wait [#allocation23], 1040  }
 0x154   :  { %3403 = vsyncadd [#allocation23], 4294966256 }
 0x155   :  { %3404 = dma.done.wait [#allocation26], 16  }
 0x156   :  { %3405 = vsyncadd [#allocation26], 4294967280  ;;  %v3427_v0 = vmov 0.0|0.0   ;;  %vm3428_vm0 = vmmov 0   ;;  %v3429_v1 = vmov 0.0   ;;  %v281_v2 = vld [vmem:[#allocation2] sm:$0xff] }
 0x157   :  { %2592 = vmatprep.subr.bf16.mxu0 %v3427_v0  ;;  %2616 = vmatprep.subr.bf16.mxu1 %v3427_v0  ;;  %v282_v3 = vld [vmem:[#allocation2 + $0x8] sm:$0xff]  ;;  %v283_v7 = vld [vmem:[#allocation2 + $0x10] sm:$0xff]  ;;  %v284_v8 = vld [vmem:[#allocation2 + $0x18] sm:$0xff]  ;;  %s4689_s18 = sld [smem:[#allocation36_spill]]  ;;  %s4690_s19 = sld [smem:[#allocation41_spill]]  ;;  %vm776_vm4 = vcmask 261120  }
 0x158   :  { %2346 = vmatprep.mubr.msk.f32.mxu0 %vm3428_vm0, %v3429_v1  ;;  %2381 = vmatprep.mubr.msk.f32.mxu1 %vm3428_vm0, %v3429_v1  ;;  %v375_v4 = vld [vmem:[#allocation6] sm:$0xff]  ;;  %v2593_v5 = vpack.c.bf16 %v282_v3, %v281_v2  ;;  %v376_v6 = vld [vmem:[#allocation6 + $0x8] sm:$0xff]  ;;  %v377_v10 = vld [vmem:[#allocation6 + $0x10] sm:$0xff]  ;;  %v2596_v12 = vpack.c.bf16 %v284_v8, %v283_v7  ;;  %s4691_s28 = sld [smem:[#allocation45_spill]]  ;;  %s4693_s24 = sld [smem:[#allocation47_spill]] }
 0x159   :  { %v2617_v9 = vpack.c.bf16 %v376_v6, %v375_v4  ;;  %v378_v11 = vld [vmem:[#allocation6 + $0x18] sm:$0xff]  ;;  %v286_v15 = vld [vmem:[#allocation2 + $0x28] sm:$0xff]  ;;  %v287_v20 = vld [vmem:[#allocation2 + $0x30] sm:$0xff] }
 0x15a   :  { %2594 = vmatpush3.bf16.msra.mxu0 %v2593_v5  ;;  %v2620_v13 = vpack.c.bf16 %v378_v11, %v377_v10  ;;  %v285_v14 = vld [vmem:[#allocation2 + $0x20] sm:$0xff]  ;;  %v380_v17 = vld [vmem:[#allocation6 + $0x28] sm:$0xff]  ;;  %v288_v21 = vld [vmem:[#allocation2 + $0x38] sm:$0xff] }
 0x15b   :  { %2618 = vmatpush3.bf16.msra.mxu1 %v2617_v9  ;;  %2595 = vmatprep.subr.bf16.mxu0 %v3427_v0  ;;  %v379_v16 = vld [vmem:[#allocation6 + $0x20] sm:$0xff]  ;;  %v2599_v18 = vpack.c.bf16 %v286_v15, %v285_v14  ;;  %v381_v22 = vld [vmem:[#allocation6 + $0x30] sm:$0xff]  ;;  %v382_v23 = vld [vmem:[#allocation6 + $0x38] sm:$0xff]  ;;  %v2602_v24 = vpack.c.bf16 %v288_v21, %v287_v20 }
 0x15c   :  { %2619 = vmatprep.subr.bf16.mxu1 %v3427_v0  ;;  %v2623_v19 = vpack.c.bf16 %v380_v17, %v379_v16  ;;  %v2626_v25 = vpack.c.bf16 %v382_v23, %v381_v22  ;;  %v289_v26 = vld [vmem:[#allocation2 + $0x40] sm:$0xff]  ;;  %v290_v27 = vld [vmem:[#allocation2 + $0x48] sm:$0xff]  ;;  %v291_v32 = vld [vmem:[#allocation2 + $0x50] sm:$0xff] }
 0x15d   :  { %v383_v28 = vld [vmem:[#allocation6 + $0x40] sm:$0xff]  ;;  %v384_v29 = vld [vmem:[#allocation6 + $0x48] sm:$0xff]  ;;  %v2605_v30 = vpack.c.bf16 %v290_v27, %v289_v26  ;;  %v292_v33 = vld [vmem:[#allocation2 + $0x58] sm:$0xff] }
 0x15e   :  { %2597 = vmatpush3.bf16.msra.mxu0 %v2596_v12  ;;  %v2629_v31 = vpack.c.bf16 %v384_v29, %v383_v28  ;;  %v385_v34 = vld [vmem:[#allocation6 + $0x50] sm:$0xff]  ;;  %v386_v35 = vld [vmem:[#allocation6 + $0x58] sm:$0xff]  ;;  %v2608_v36 = vpack.c.bf16 %v292_v33, %v291_v32  ;;  %v294_v39 = vld [vmem:[#allocation2 + $0x68] sm:$0xff] }
 0x15f   :  { %2621 = vmatpush3.bf16.msra.mxu1 %v2620_v13  ;;  %2598 = vmatprep.subr.bf16.mxu0 %v3427_v0  ;;  %v2632_v37 = vpack.c.bf16 %v386_v35, %v385_v34  ;;  %v293_v38 = vld [vmem:[#allocation2 + $0x60] sm:$0xff]  ;;  %v388_v41 = vld [vmem:[#allocation6 + $0x68] sm:$0xff]  ;;  %v296_v45 = vld [vmem:[#allocation2 + $0x78] sm:$0xff] }
 0x160   :  { %2622 = vmatprep.subr.bf16.mxu1 %v3427_v0  ;;  %v387_v40 = vld [vmem:[#allocation6 + $0x60] sm:$0xff]  ;;  %v2611_v42 = vpack.c.bf16 %v294_v39, %v293_v38  ;;  %v295_v44 = vld [vmem:[#allocation2 + $0x70] sm:$0xff]  ;;  %v390_v47 = vld [vmem:[#allocation6 + $0x78] sm:$0xff] }
 0x161   :  { %v2635_v43 = vpack.c.bf16 %v388_v41, %v387_v40  ;;  %v389_v46 = vld [vmem:[#allocation6 + $0x70] sm:$0xff]  ;;  %v2614_v48 = vpack.c.bf16 %v296_v45, %v295_v44  ;;  %v3799_v50 = vld [vmem:[%s4689_s18] sm:$0x3]  ;;  %v475_v52 = vld [vmem:[#allocation2 + $0x88] sm:$0xff] }
 0x162   :  { %2600 = vmatpush3.bf16.msra.mxu0 %v2599_v18  ;;  %v2638_v49 = vpack.c.bf16 %v390_v47, %v389_v46  ;;  %v474_v51 = vld [vmem:[#allocation2 + $0x80] sm:$0xff]  ;;  %v571_v54 = vld [vmem:[#allocation6 + $0x88] sm:$0xff]  ;;  %v374_v55 = vmul.f32 %v3799_v50, %v3799_v50  ;;  %v477_v58 = vld [vmem:[#allocation2 + $0x98] sm:$0xff] }
 0x163   :  { %2624 = vmatpush3.bf16.msra.mxu1 %v2623_v19  ;;  %2601 = vmatprep.subr.bf16.mxu0 %v3427_v0  ;;  %v570_v53 = vld [vmem:[#allocation6 + $0x80] sm:$0xff]  ;;  %v2641_v56 = vpack.c.bf16 %v475_v52, %v474_v51  ;;  %v476_v57 = vld [vmem:[#allocation2 + $0x90] sm:$0xff]  ;;  %v573_v61 = vld [vmem:[#allocation6 + $0x98] sm:$0xff] }
 0x164   :  { %2625 = vmatprep.subr.bf16.mxu1 %v3427_v0  ;;  %v2665_v59 = vpack.c.bf16 %v571_v54, %v570_v53  ;;  %v572_v60 = vld [vmem:[#allocation6 + $0x90] sm:$0xff]  ;;  %v2644_v62 = vpack.c.bf16 %v477_v58, %v476_v57  ;;  %v478_v63 = vld [vmem:[#allocation2 + $0xa0] sm:$0xff]  ;;  %v479_v2 = vld [vmem:[#allocation2 + $0xa8] sm:$0xff] }
 0x165   :  { %v2668_v3 = vpack.c.bf16 %v573_v61, %v572_v60  ;;  %v574_v4 = vld [vmem:[#allocation6 + $0xa0] sm:$0xff]  ;;  %v575_v5 = vld [vmem:[#allocation6 + $0xa8] sm:$0xff]  ;;  %v2647_v6 = vpack.c.bf16 %v479_v2, %v478_v63  ;;  %v481_v8 = vld [vmem:[#allocation2 + $0xb8] sm:$0xff] }
 0x166   :  { %2603 = vmatpush3.bf16.msra.mxu0 %v2602_v24  ;;  %v480_v7 = vld [vmem:[#allocation2 + $0xb0] sm:$0xff]  ;;  %v2671_v9 = vpack.c.bf16 %v575_v5, %v574_v4  ;;  %v577_v11 = vld [vmem:[#allocation6 + $0xb8] sm:$0xff]  ;;  %v483_v14 = vld [vmem:[#allocation2 + $0xc8] sm:$0xff] }
 0x167   :  { %2627 = vmatpush3.bf16.msra.mxu1 %v2626_v25  ;;  %2604 = vmatprep.subr.bf16.mxu0 %v3427_v0  ;;  %v576_v10 = vld [vmem:[#allocation6 + $0xb0] sm:$0xff]  ;;  %v2650_v12 = vpack.c.bf16 %v481_v8, %v480_v7  ;;  %v482_v13 = vld [vmem:[#allocation2 + $0xc0] sm:$0xff]  ;;  %v579_v17 = vld [vmem:[#allocation6 + $0xc8] sm:$0xff] }
 0x168   :  { %2628 = vmatprep.subr.bf16.mxu1 %v3427_v0  ;;  %v2674_v15 = vpack.c.bf16 %v577_v11, %v576_v10  ;;  %v578_v16 = vld [vmem:[#allocation6 + $0xc0] sm:$0xff]  ;;  %v2653_v18 = vpack.c.bf16 %v483_v14, %v482_v13  ;;  %v484_v19 = vld [vmem:[#allocation2 + $0xd0] sm:$0xff]  ;;  %v485_v20 = vld [vmem:[#allocation2 + $0xd8] sm:$0xff] }
 0x169   :  { %v2677_v21 = vpack.c.bf16 %v579_v17, %v578_v16  ;;  %v2656_v22 = vpack.c.bf16 %v485_v20, %v484_v19  ;;  %v486_v23 = vld [vmem:[#allocation2 + $0xe0] sm:$0xff]  ;;  %v487_v24 = vld [vmem:[#allocation2 + $0xe8] sm:$0xff]  ;;  %v488_v26 = vld [vmem:[#allocation2 + $0xf0] sm:$0xff] }
 0x16a   :  { %2606 = vmatpush3.bf16.msra.mxu0 %v2605_v30  ;;  %v2659_v25 = vpack.c.bf16 %v487_v24, %v486_v23  ;;  %v489_v27 = vld [vmem:[#allocation2 + $0xf8] sm:$0xff]  ;;  %v582_v32 = vld [vmem:[#allocation6 + $0xe0] sm:$0xff]  ;;  %v583_v33 = vld [vmem:[#allocation6 + $0xe8] sm:$0xff] }
 0x16b   :  { %2630 = vmatpush3.bf16.msra.mxu1 %v2629_v31  ;;  %2607 = vmatprep.subr.bf16.mxu0 %v3427_v0  ;;  %v2662_v28 = vpack.c.bf16 %v489_v27, %v488_v26  ;;  %v580_v29 = vld [vmem:[#allocation6 + $0xd0] sm:$0xff]  ;;  %v581_v30 = vld [vmem:[#allocation6 + $0xd8] sm:$0xff]  ;;  %v2683_v34 = vpack.c.bf16 %v583_v33, %v582_v32  ;;  %v670_v39 = vld [vmem:[%s4690_s19 + $0x8] sm:$0xff] }
 0x16c   :  { %2631 = vmatprep.subr.bf16.mxu1 %v3427_v0  ;;  %v2680_v31 = vpack.c.bf16 %v581_v30, %v580_v29  ;;  %v584_v35 = vld [vmem:[#allocation6 + $0xf0] sm:$0xff]  ;;  %v669_v38 = vld [vmem:[%s4690_s19] sm:$0xff]  ;;  %v674_v45 = vld [vmem:[%s4690_s19 + $0x28] sm:$0xff] }
 0x16d   :  { %v671_v40 = vld [vmem:[%s4690_s19 + $0x10] sm:$0xff]  ;;  %v2689_v41 = vpack.c.bf16 %v670_v39, %v669_v38  ;;  %v673_v44 = vld [vmem:[%s4690_s19 + $0x20] sm:$0xff]  ;;  %v678_v52 = vld [vmem:[%s4690_s19 + $0x48] sm:$0xff] }
 0x16e   :  { %2609 = vmatpush3.bf16.msra.mxu0 %v2608_v36  ;;  %v585_v36 = vld [vmem:[#allocation6 + $0xf8] sm:$0xff]  ;;  %v2695_v46 = vpack.c.bf16 %v674_v45, %v673_v44  ;;  %v675_v47 = vld [vmem:[%s4690_s19 + $0x30] sm:$0xff]  ;;  %v2061_v58 = vld [vmem:[#allocation7] ss:$0 sm:$0xff] }
 0x16f   :  { %2633 = vmatpush3.bf16.msra.mxu1 %v2632_v37  ;;  %2610 = vmatprep.subr.bf16.mxu0 %v3427_v0  ;;  %v2686_v37 = vpack.c.bf16 %v585_v36, %v584_v35  ;;  %v677_v51 = vld [vmem:[%s4690_s19 + $0x40] sm:$0xff]  ;;  %v679_v54 = vld [vmem:[%s4690_s19 + $0x50] sm:$0xff]  ;;  %v684_v16 = vld [vmem:[%s4690_s19 + $0x78] sm:$0xff] }
 0x170   :  { %2634 = vmatprep.subr.bf16.mxu1 %v3427_v0  ;;  %v2701_v53 = vpack.c.bf16 %v678_v52, %v677_v51  ;;  %v2060_v57 = vld [vmem:[#allocation4] ss:$0 sm:$0xff]  ;;  %v2062_v8 = vld [vmem:[#allocation4 + $0x1] ss:$0 sm:$0xff]  ;;  %v766_v23 = vld [vmem:[#allocation10 + $0x8] sm:$0xff] }
 0x171   :  { %v681_v13 = vld [vmem:[%s4690_s19 + $0x60] sm:$0xff]  ;;  %v854_v32 = vld [vmem:[#allocation13 + $0x8] sm:$0xff] }
 0x172   :  { %2612 = vmatpush3.bf16.msra.mxu0 %v2611_v42  ;;  %v672_v42 = vld [vmem:[%s4690_s19 + $0x18] sm:$0xff]  ;;  %v937_v45 = vld [vmem:[#allocation16] sm:$0xff] }
 0x173   :  { %2636 = vmatpush3.bf16.msra.mxu1 %v2635_v43  ;;  %2613 = vmatprep.subr.bf16.mxu0 %v3427_v0  ;;  %v2692_v43 = vpack.c.bf16 %v672_v42, %v671_v40  ;;  %v768_v29 = vld [vmem:[#allocation10 + $0x18] sm:$0xff] }
 0x174   :  { %2637 = vmatprep.subr.bf16.mxu1 %v3427_v0  ;;  %v855_v40 = vld [vmem:[#allocation13 + $0x10] sm:$0xff] }
 0x175   :  { %v939_v52 = vld [vmem:[#allocation16 + $0x10] sm:$0xff] }
 0x176   :  { %2615 = vmatpush3.bf16.msra.mxu0 %v2614_v48  ;;  %v676_v48 = vld [vmem:[%s4690_s19 + $0x38] sm:$0xff] }
 0x177   :  { %2639 = vmatpush3.bf16.msra.mxu1 %v2638_v49  ;;  %2640 = vmatprep.subr.bf16.mxu0 %v3427_v0  ;;  %v2698_v49 = vpack.c.bf16 %v676_v48, %v675_v47 }
 0x178   :  { %2664 = vmatprep.subr.bf16.mxu1 %v3427_v0 }
 0x179   :  { %2347 = vmatmul.mubr.f32.vlgmr.msra.gmra.mrb[0].mxu0 %v3799_v50 }
 0x17a   :  { %2382 = vmatmul.mubr.f32.vlgmr.msra.gmra.mrb[0].mxu1 %v374_v55  ;;  %2642 = vmatpush3.bf16.msra.mxu0 %v2641_v56  ;;  %v680_v55 = vld [vmem:[%s4690_s19 + $0x58] sm:$0xff] }
 0x17b   :  { %2643 = vmatprep.subr.bf16.mxu0 %v3427_v0  ;;  %2416 = vmatprep.mubr.msk.f32.mxu0 %vm3428_vm0, %v3429_v1  ;;  %v2704_v56 = vpack.c.bf16 %v680_v55, %v679_v54 }
 0x17c   :  { %2666 = vmatpush3.bf16.msra.mxu1 %v2665_v59  ;;  %2451 = vmatprep.mubr.msk.f32.mxu1 %vm3428_vm0, %v3429_v1 }
 0x17d   :  { %2667 = vmatprep.subr.bf16.mxu1 %v3427_v0 }
 0x17e   :  { %2645 = vmatpush3.bf16.msra.mxu0 %v2644_v62 }
 0x17f   :  { %2646 = vmatprep.subr.bf16.mxu0 %v3427_v0 }
 0x180   :  { %2669 = vmatpush3.bf16.msra.mxu1 %v2668_v3 }
 0x181   :  { %2670 = vmatprep.subr.bf16.mxu1 %v3427_v0 }
 0x182   :  { %2648 = vmatpush3.bf16.msra.mxu0 %v2647_v6 }
 0x183   :  { %2649 = vmatprep.subr.bf16.mxu0 %v3427_v0 }
 0x184   :  { %2672 = vmatpush3.bf16.msra.mxu1 %v2671_v9 }
 0x185   :  { %2673 = vmatprep.subr.bf16.mxu1 %v3427_v0 }
 0x186   :  { %2651 = vmatpush3.bf16.msra.mxu0 %v2650_v12 }
 0x187   :  { %2652 = vmatprep.subr.bf16.mxu0 %v3427_v0 }
 0x188   :  { %2675 = vmatpush3.bf16.msra.mxu1 %v2674_v15  ;;  %v683_v15 = vld [vmem:[%s4690_s19 + $0x70] sm:$0xff] }
 0x189   :  { %2676 = vmatprep.subr.bf16.mxu1 %v3427_v0  ;;  %v2710_v17 = vpack.c.bf16 %v684_v16, %v683_v15  ;;  %v1025_v15 = vld [vmem:[#allocation18 + $0x8] sm:$0xff]  ;;  %v1026_v16 = vld [vmem:[#allocation18 + $0x10] sm:$0xff] }
 0x18a   :  { %2654 = vmatpush3.bf16.msra.mxu0 %v2653_v18  ;;  %v2063_v18 = vld [vmem:[#allocation7 + $0x1] ss:$0 sm:$0xff] }
 0x18b   :  { %2655 = vmatprep.subr.bf16.mxu0 %v3427_v0 }
 0x18c   :  { %2678 = vmatpush3.bf16.msra.mxu1 %v2677_v21 }
 0x18d   :  { %2679 = vmatprep.subr.bf16.mxu1 %v3427_v0 }
 0x18e   :  { %2657 = vmatpush3.bf16.msra.mxu0 %v2656_v22  ;;  %v765_v22 = vld [vmem:[#allocation10] sm:$0xff] }
 0x18f   :  { %2658 = vmatprep.subr.bf16.mxu0 %v3427_v0  ;;  %v2713_v26 = vpack.c.bf16 %v766_v23, %v765_v22  ;;  %v1030_v23 = vld [vmem:[#allocation18 + $0x30] sm:$0xff] }
 0x190   :  { %2681 = vmatpush3.bf16.msra.mxu1 %v2680_v31  ;;  %v853_v31 = vld [vmem:[#allocation13] sm:$0xff] }
 0x191   :  { %2682 = vmatprep.subr.bf16.mxu1 %v3427_v0  ;;  %v2719_v33 = vpack.c.bf16 %v854_v32, %v853_v31  ;;  %v1036_v32 = vld [vmem:[#allocation18 + $0x60] sm:$0xff] }
 0x192   :  { %2660 = vmatpush3.bf16.msra.mxu0 %v2659_v25 }
 0x193   :  { %2661 = vmatprep.subr.bf16.mxu0 %v3427_v0 }
 0x194   :  { %2684 = vmatpush3.bf16.msra.mxu1 %v2683_v34  ;;  %v2064_v34 = vld [vmem:[#allocation9] ss:$0 sm:$0xff] }
 0x195   :  { %2685 = vmatprep.subr.bf16.mxu1 %v3427_v0 }
 0x196   :  { %2663 = vmatpush3.bf16.msra.mxu0 %v2662_v28  ;;  %v767_v28 = vld [vmem:[#allocation10 + $0x10] sm:$0xff] }
 0x197   :  { %2688 = vmatprep.subr.bf16.mxu0 %v3427_v0  ;;  %v2716_v30 = vpack.c.bf16 %v768_v29, %v767_v28  ;;  %v1034_v29 = vld [vmem:[#allocation18 + $0x50] sm:$0xff] }
 0x198   :  { %2687 = vmatpush3.bf16.msra.mxu1 %v2686_v37 }
 0x199   :  { %2417 = vmatmul.mubr.f32.vlgmr.msra.gmra.mrb[2].mxu0 %v3799_v50  ;;  %2718 = vmatprep.subr.bf16.mxu1 %v3427_v0 }
 0x19a   :  { %2486 = vmatprep.mubr.msk.f32.mxu0 %vm3428_vm0, %v3429_v1  ;;  %2690 = vmatpush3.bf16.msra.mxu0 %v2689_v41  ;;  %v856_v41 = vld [vmem:[#allocation13 + $0x18] sm:$0xff] }
 0x19b   :  { %2691 = vmatprep.subr.bf16.mxu0 %v3427_v0  ;;  %v2722_v42 = vpack.c.bf16 %v856_v41, %v855_v40  ;;  %v2067_v40 = vld [vmem:[#allocation15] ss:$0 sm:$0xff] }
 0x19c   :  { %v1128_v41 = vld [vmem:[%s4650_s14 + $0x48] sm:$0xff] }
 0x19e   :  { %2693 = vmatpush3.bf16.msra.mxu0 %v2692_v43  ;;  %v2065_v43 = vld [vmem:[#allocation12] ss:$0 sm:$0xff] }
 0x19f   :  { %2694 = vmatprep.subr.bf16.mxu0 %v3427_v0 }
 0x1a2   :  { %2696 = vmatpush3.bf16.msra.mxu0 %v2695_v46  ;;  %v938_v46 = vld [vmem:[#allocation16 + $0x8] sm:$0xff] }
 0x1a3   :  { %2697 = vmatprep.subr.bf16.mxu0 %v3427_v0  ;;  %v2725_v51 = vpack.c.bf16 %v938_v46, %v937_v45 }
 0x1a6   :  { %2699 = vmatpush3.bf16.msra.mxu0 %v2698_v49 }
 0x1a7   :  { %2700 = vmatprep.subr.bf16.mxu0 %v3427_v0 }
 0x1aa   :  { %2702 = vmatpush3.bf16.msra.mxu0 %v2701_v53  ;;  %v940_v53 = vld [vmem:[#allocation16 + $0x18] sm:$0xff] }
 0x1ab   :  { %2703 = vmatprep.subr.bf16.mxu0 %v3427_v0  ;;  %v2728_v55 = vpack.c.bf16 %v940_v53, %v939_v52  ;;  %v1140_v52 = vld [vmem:[%s4650_s14 + $0xa8] sm:$0xff] }
 0x1ae   :  { %2705 = vmatpush3.bf16.msra.mxu0 %v2704_v56  ;;  %v941_v56 = vld [vmem:[#allocation16 + $0x20] sm:$0xff] }
 0x1af   :  { %2706 = vmatprep.subr.bf16.mxu0 %v3427_v0 }
 0x24c   :  { %v370_v59 = vpop.f32.mrb[0].mxu0 }
 0x24d   :  { %v371_v60 = vadd.f32 %v2060_v57, %v370_v59  ;;  %v2348_v61 = vpop.f32.mrb[1].mxu0  ;;  %v464_v62 = vpop.f32.mrb[0].mxu1  ;;  %v942_v57 = vld [vmem:[#allocation16 + $0x28] sm:$0xff]  ;;  %v943_v59 = vld [vmem:[#allocation16 + $0x30] sm:$0xff] }
 0x24e   :  { %v465_v63 = vadd.f32 %v2061_v58, %v464_v62  ;;  %v2383_v2 = vpop.f32.mrb[1].mxu1  ;;  %v2731_v58 = vpack.c.bf16 %v942_v57, %v941_v56  ;;  %v945_v62 = vld [vmem:[#allocation16 + $0x40] sm:$0xff]  ;;  %v1139_v56 = vld [vmem:[%s4650_s14 + $0xa0] sm:$0xff] }
 0x24f   :  { %v468_v3 = vmul.f32 %v371_v60, %v3799_v50  ;;  %v682_v50 = vld [vmem:[%s4690_s19 + $0x68] sm:$0xff]  ;;  %s4692_s19 = sld [smem:[#allocation46_spill]] }
 0x250   :  { %v2707_v14 = vpack.c.bf16 %v682_v50, %v681_v13  ;;  %v944_v60 = vld [vmem:[#allocation16 + $0x38] sm:$0xff] }
 0x251   :  { %v469_v4 = vadd.f32 %v468_v3, %v465_v63  ;;  %v2734_v61 = vpack.c.bf16 %v944_v60, %v943_v59  ;;  %v946_v63 = vld [vmem:[#allocation16 + $0x48] sm:$0xff]  ;;  %v947_v3 = vld [vmem:[#allocation16 + $0x50] sm:$0xff]  ;;  %v1124_v13 = vld [vmem:[%s4650_s14 + $0x28] sm:$0xff] }
 0x252   :  { %2708 = vmatpush3.bf16.msra.mxu0 %v2707_v14  ;;  %v2737_v2 = vpack.c.bf16 %v946_v63, %v945_v62  ;;  %v1024_v14 = vld [vmem:[#allocation18] sm:$0xff]  ;;  %v1147_v62 = vld [vmem:[%s4650_s14 + $0xe0] sm:$0xff] }
 0x253   :  { %vm470_vm1 = vcmp.gt.f32.partialorder %v469_v4, 0.0  ;;  %v471_v5 = vmul.f32 0.01, %v469_v4  ;;  %2709 = vmatprep.subr.bf16.mxu0 %v3427_v0  ;;  %v1144_v57 = vld [vmem:[%s4650_s14 + $0xc8] sm:$0xff] }
 0x254   :  { %v1152_v63 = vld [vmem:[%s4650_s14 + $0x108] sm:$0xff] }
 0x255   :  { %v472_v6 = vsel %vm470_vm1, %v469_v4, %v471_v5  ;;  %v948_v4 = vld [vmem:[#allocation16 + $0x58] sm:$0xff] }
 0x256   :  { %v568_v7 = vmul.f32 %v472_v6, %v472_v6  ;;  %2711 = vmatpush3.bf16.msra.mxu0 %v2710_v17  ;;  %v2740_v5 = vpack.c.bf16 %v948_v4, %v947_v3  ;;  %v2749_v17 = vpack.c.bf16 %v1025_v15, %v1024_v14 }
 0x257   :  { %2712 = vmatprep.subr.bf16.mxu0 %v3427_v0 }
 0x258   :  { %2452 = vmatmul.mubr.f32.vlgmr.msra.gmra.mrb[2].mxu1 %v568_v7  ;;  %v950_v7 = vld [vmem:[#allocation16 + $0x68] sm:$0xff] }
 0x259   :  { %2508 = vmatprep.mubr.msk.f32.mxu1 %vm3428_vm0, %v3429_v1  ;;  %2720 = vmatpush3.bf16.msra.mxu1 %v2719_v33  ;;  %v1037_v33 = vld [vmem:[#allocation18 + $0x68] sm:$0xff] }
 0x25a   :  { %2721 = vmatprep.subr.bf16.mxu1 %v3427_v0 }
 0x25d   :  { %2723 = vmatpush3.bf16.msra.mxu1 %v2722_v42  ;;  %v1132_v42 = vld [vmem:[%s4650_s14 + $0x68] sm:$0xff] }
 0x25e   :  { %2724 = vmatprep.subr.bf16.mxu1 %v3427_v0 }
 0x26c   :  { %v564_v9 = vpop.f32.mrb[2].mxu0 }
 0x26d   :  { %v565_v10 = vadd.f32 %v2062_v8, %v564_v9  ;;  %v2418_v11 = vpop.f32.mrb[3].mxu0  ;;  %v951_v9 = vld [vmem:[#allocation16 + $0x70] sm:$0xff] }
 0x26f   :  { %v664_v12 = vmul.f32 %v565_v10, %v472_v6  ;;  %v949_v6 = vld [vmem:[#allocation16 + $0x60] sm:$0xff]  ;;  %v952_v10 = vld [vmem:[#allocation16 + $0x78] sm:$0xff] }
 0x270   :  { %v2743_v8 = vpack.c.bf16 %v950_v7, %v949_v6  ;;  %v2746_v11 = vpack.c.bf16 %v952_v10, %v951_v9  ;;  %v1155_v6 = vld [vmem:[%s4650_s14 + $0x120] sm:$0xff]  ;;  %v1160_v7 = vld [vmem:[%s4650_s14 + $0x148] sm:$0xff] }
 0x32b   :  { %v660_v19 = vpop.f32.mrb[2].mxu1 }
 0x32c   :  { %v661_v20 = vadd.f32 %v2063_v18, %v660_v19  ;;  %v2453_v21 = vpop.f32.mrb[3].mxu1  ;;  %v1027_v18 = vld [vmem:[#allocation18 + $0x18] sm:$0xff] }
 0x32d   :  { %v2752_v19 = vpack.c.bf16 %v1027_v18, %v1026_v16  ;;  %v1029_v21 = vld [vmem:[#allocation18 + $0x28] sm:$0xff]  ;;  %v1167_v16 = vld [vmem:[%s4650_s14 + $0x180] sm:$0xff]  ;;  %v1176_v18 = vld [vmem:[%s4650_s14 + $0x1c8] sm:$0xff] }
 0x32e   :  { %v665_v24 = vadd.f32 %v664_v12, %v661_v20  ;;  %v1120_v12 = vld [vmem:[%s4650_s14 + $0x8] sm:$0xff] }
 0x32f   :  { %v2772_v50 = vpack.c.bf16 %v1124_v13, %v1120_v12  ;;  %v1028_v20 = vld [vmem:[#allocation18 + $0x20] sm:$0xff]  ;;  %v1163_v12 = vld [vmem:[%s4650_s14 + $0x160] sm:$0xff] }
 0x330   :  { %v667_v25 = vmul.f32 0.01, %v665_v24  ;;  %vm666_vm2 = vcmp.gt.f32.partialorder %v665_v24, 0.0  ;;  %v2755_v22 = vpack.c.bf16 %v1029_v21, %v1028_v20  ;;  %v1168_v13 = vld [vmem:[%s4650_s14 + $0x188] sm:$0xff] }
 0x332   :  { %v668_v27 = vsel %vm666_vm2, %v665_v24, %v667_v25  ;;  %v1031_v24 = vld [vmem:[#allocation18 + $0x38] sm:$0xff] }
 0x333   :  { %2487 = vmatmul.mubr.f32.vlgmr.msra.gmra.mrb[4].mxu0 %v668_v27  ;;  %v2758_v25 = vpack.c.bf16 %v1031_v24, %v1030_v23  ;;  %v1033_v27 = vld [vmem:[#allocation18 + $0x48] sm:$0xff]  ;;  %v1179_v23 = vld [vmem:[%s4650_s14 + $0x1e0] sm:$0xff] }
 0x334   :  { %2714 = vmatpush3.bf16.msra.mxu0 %v2713_v26  ;;  %2497 = vmatprep.mubr.msk.f32.mxu0 %vm3428_vm0, %v3429_v1  ;;  %v1032_v26 = vld [vmem:[#allocation18 + $0x40] sm:$0xff] }
 0x335   :  { %2715 = vmatprep.subr.bf16.mxu0 %v3427_v0  ;;  %v2761_v28 = vpack.c.bf16 %v1033_v27, %v1032_v26  ;;  %v1126_v26 = vld [vmem:[%s4650_s14 + $0x38] sm:$0xff] }
 0x338   :  { %2717 = vmatpush3.bf16.msra.mxu0 %v2716_v30  ;;  %v1035_v30 = vld [vmem:[#allocation18 + $0x58] sm:$0xff] }
 0x339   :  { %2748 = vmatprep.subr.bf16.mxu0 %v3427_v0  ;;  %v2764_v31 = vpack.c.bf16 %v1035_v30, %v1034_v29  ;;  %v1330_v29 = vld [vmem:[%s4651_s15 + $0x28] sm:$0xff] }
 0x406   :  { %v758_v35 = vpop.f32.mrb[4].mxu0 }
 0x407   :  { %v759_v36 = vadd.f32 %v2064_v34, %v758_v35  ;;  %v2488_v37 = vpop.f32.mrb[5].mxu0  ;;  %v2767_v34 = vpack.c.bf16 %v1037_v33, %v1036_v32  ;;  %v1038_v35 = vld [vmem:[#allocation18 + $0x70] sm:$0xff] }
 0x408   :  { %v1329_v32 = vld [vmem:[%s4651_s15 + $0x20] sm:$0xff] }
 0x409   :  { %vm762_vm3 = vcmp.gt.f32.partialorder %v759_v36, 0.0  ;;  %v763_v38 = vmul.f32 0.01, %v759_v36 }
 0x40b   :  { %v764_v39 = vsel %vm762_vm3, %v759_v36, %v763_v38  ;;  %v1039_v36 = vld [vmem:[#allocation18 + $0x78] sm:$0xff] }
 0x40c   :  { %2498 = vmatmul.mubr.msk.f32.vlgmr.msra.gmra.mrb[6].mxu0 %vm776_vm4, %v764_v39  ;;  %v2770_v37 = vpack.c.bf16 %v1039_v36, %v1038_v35  ;;  %v1119_v38 = vld [vmem:[%s4650_s14] sm:$0xff]  ;;  %v1338_v35 = vld [vmem:[%s4651_s15 + $0x68] sm:$0xff] }
 0x40d   :  { %2578 = vmatprep.mubr.msk.f32.mxu0 %vm3428_vm0, %v3429_v1  ;;  %2750 = vmatpush3.bf16.msra.mxu0 %v2749_v17  ;;  %v1123_v39 = vld [vmem:[%s4650_s14 + $0x20] sm:$0xff] }
 0x40e   :  { %2751 = vmatprep.subr.bf16.mxu0 %v3427_v0  ;;  %v1171_v17 = vld [vmem:[%s4650_s14 + $0x1a0] sm:$0xff] }
 0x40f   :  { %v2798_v20 = vpack.c.bf16 %v1171_v17, %v1167_v16 }
 0x411   :  { %2753 = vmatpush3.bf16.msra.mxu0 %v2752_v19  ;;  %v1180_v19 = vld [vmem:[%s4650_s14 + $0x1e8] sm:$0xff] }
 0x412   :  { %2754 = vmatprep.subr.bf16.mxu0 %v3427_v0  ;;  %v2800_v21 = vpack.c.bf16 %v1180_v19, %v1176_v18  ;;  %v1153_v18 = vld [vmem:[%s4650_s14 + $0x110] sm:$0xff] }
 0x413   :  { %v1157_v19 = vld [vmem:[%s4650_s14 + $0x130] sm:$0xff] }
 0x415   :  { %2756 = vmatpush3.bf16.msra.mxu0 %v2755_v22  ;;  %v1175_v22 = vld [vmem:[%s4650_s14 + $0x1c0] sm:$0xff] }
 0x416   :  { %2757 = vmatprep.subr.bf16.mxu0 %v3427_v0  ;;  %v2802_v24 = vpack.c.bf16 %v1179_v23, %v1175_v22  ;;  %v2822_v22 = vpack.c.bf16 %v1157_v19, %v1153_v18  ;;  %v1368_v18 = vld [vmem:[%s4651_s15 + $0x158] sm:$0xff] }
 0x419   :  { %2759 = vmatpush3.bf16.msra.mxu0 %v2758_v25  ;;  %v1122_v25 = vld [vmem:[%s4650_s14 + $0x18] sm:$0xff] }
 0x41a   :  { %2760 = vmatprep.subr.bf16.mxu0 %v3427_v0  ;;  %v2804_v27 = vpack.c.bf16 %v1126_v26, %v1122_v25  ;;  %v1165_v25 = vld [vmem:[%s4650_s14 + $0x170] sm:$0xff]  ;;  %v1170_v26 = vld [vmem:[%s4650_s14 + $0x198] sm:$0xff] }
 0x41d   :  { %2762 = vmatpush3.bf16.msra.mxu0 %v2761_v28  ;;  %v1326_v28 = vld [vmem:[%s4651_s15 + $0x8] sm:$0xff] }
 0x41e   :  { %2763 = vmatprep.subr.bf16.mxu0 %v3427_v0  ;;  %v2836_v30 = vpack.c.bf16 %v1330_v29, %v1326_v28 }
 0x421   :  { %2765 = vmatpush3.bf16.msra.mxu0 %v2764_v31  ;;  %v1325_v31 = vld [vmem:[%s4651_s15] sm:$0xff] }
 0x422   :  { %2766 = vmatprep.subr.bf16.mxu0 %v3427_v0  ;;  %v2838_v33 = vpack.c.bf16 %v1329_v32, %v1325_v31  ;;  %v1173_v31 = vld [vmem:[%s4650_s14 + $0x1b0] sm:$0xff]  ;;  %v1178_v32 = vld [vmem:[%s4650_s14 + $0x1d8] sm:$0xff] }
 0x425   :  { %2768 = vmatpush3.bf16.msra.mxu0 %v2767_v34  ;;  %v1334_v34 = vld [vmem:[%s4651_s15 + $0x48] sm:$0xff] }
 0x426   :  { %2769 = vmatprep.subr.bf16.mxu0 %v3427_v0  ;;  %v2840_v36 = vpack.c.bf16 %v1338_v35, %v1334_v34 }
 0x429   :  { %2771 = vmatpush3.bf16.msra.mxu0 %v2770_v37  ;;  %v1333_v37 = vld [vmem:[%s4651_s15 + $0x40] sm:$0xff] }
 0x42a   :  { %2805 = vmatprep.subr.bf16.mxu0 %v2804_v27  ;;  %v1174_v27 = vld [vmem:[%s4650_s14 + $0x1b8] sm:$0xff] }
 0x42b   :  { %v2828_v29 = vpack.c.bf16 %v1174_v27, %v1170_v26  ;;  %v1371_v26 = vld [vmem:[%s4651_s15 + $0x170] sm:$0xff]  ;;  %v1374_v27 = vld [vmem:[%s4651_s15 + $0x188] sm:$0xff] }
 0x4df   :  { %v846_v44 = vpop.f32.mrb[6].mxu0 }
 0x4e0   :  { %v847_v47 = vadd.f32 %v2065_v43, %v846_v44  ;;  %v2499_v48 = vpop.f32.mrb[7].mxu0  ;;  %v2774_v44 = vpack.c.bf16 %v1123_v39, %v1119_v38  ;;  %v1337_v38 = vld [vmem:[%s4651_s15 + $0x60] sm:$0xff] }
 0x4e1   :  { %v1127_v48 = vld [vmem:[%s4650_s14 + $0x40] sm:$0xff]  ;;  %v2842_v39 = vpack.c.bf16 %v1337_v38, %v1333_v37  ;;  %v1181_v37 = vld [vmem:[%s4650_s14 + $0x1f0] sm:$0xff]  ;;  %v1328_v38 = vld [vmem:[%s4651_s15 + $0x18] sm:$0xff] }
 0x4e2   :  { %vm850_vm5 = vcmp.gt.f32.partialorder %v847_v47, 0.0  ;;  %v851_v49 = vmul.f32 0.01, %v847_v47 }
 0x4e4   :  { %v852_v54 = vsel %vm850_vm5, %v847_v47, %v851_v49  ;;  %v2776_v47 = vpack.c.bf16 %v1132_v42, %v1128_v41  ;;  %v1131_v49 = vld [vmem:[%s4650_s14 + $0x60] sm:$0xff]  ;;  %v1346_v41 = vld [vmem:[%s4651_s15 + $0xa8] sm:$0xff] }
 0x4e5   :  { %2509 = vmatmul.mubr.msk.f32.vlgmr.msra.gmra.mrb[4].mxu1 %vm776_vm4, %v852_v54  ;;  %v2778_v53 = vpack.c.bf16 %v1131_v49, %v1127_v48  ;;  %v1354_v48 = vld [vmem:[%s4651_s15 + $0xe8] sm:$0xff] }
 0x4e6   :  { %2726 = vmatpush3.bf16.msra.mxu1 %v2725_v51  ;;  %2543 = vmatprep.mubr.msk.f32.mxu1 %vm3428_vm0, %v3429_v1  ;;  %v1136_v51 = vld [vmem:[%s4650_s14 + $0x88] sm:$0xff] }
 0x4e7   :  { %2727 = vmatprep.subr.bf16.mxu1 %v3427_v0  ;;  %v2780_v54 = vpack.c.bf16 %v1140_v52, %v1136_v51  ;;  %v1349_v51 = vld [vmem:[%s4651_s15 + $0xc0] sm:$0xff] }
 0x4e8   :  { %v1353_v52 = vld [vmem:[%s4651_s15 + $0xe0] sm:$0xff] }
 0x4ea   :  { %2729 = vmatpush3.bf16.msra.mxu1 %v2728_v55  ;;  %v1135_v55 = vld [vmem:[%s4650_s14 + $0x80] sm:$0xff] }
 0x4eb   :  { %2730 = vmatprep.subr.bf16.mxu1 %v3427_v0  ;;  %v2782_v59 = vpack.c.bf16 %v1139_v56, %v1135_v55  ;;  %v1125_v55 = vld [vmem:[%s4650_s14 + $0x30] sm:$0xff]  ;;  %v1130_v56 = vld [vmem:[%s4650_s14 + $0x58] sm:$0xff] }
 0x4ee   :  { %2732 = vmatpush3.bf16.msra.mxu1 %v2731_v58  ;;  %v1148_v58 = vld [vmem:[%s4650_s14 + $0xe8] sm:$0xff] }
 0x4ef   :  { %2733 = vmatprep.subr.bf16.mxu1 %v3427_v0  ;;  %v2784_v60 = vpack.c.bf16 %v1148_v58, %v1144_v57  ;;  %v1134_v57 = vld [vmem:[%s4650_s14 + $0x78] sm:$0xff] }
 0x4f2   :  { %2735 = vmatpush3.bf16.msra.mxu1 %v2734_v61  ;;  %v1143_v61 = vld [vmem:[%s4650_s14 + $0xc0] sm:$0xff] }
 0x4f3   :  { %2736 = vmatprep.subr.bf16.mxu1 %v3427_v0  ;;  %v2786_v3 = vpack.c.bf16 %v1147_v62, %v1143_v61  ;;  %v2808_v62 = vpack.c.bf16 %v1134_v57, %v1130_v56 }
 0x4f6   :  { %2738 = vmatpush3.bf16.msra.mxu1 %v2737_v2  ;;  %v1156_v2 = vld [vmem:[%s4650_s14 + $0x128] sm:$0xff] }
 0x4f7   :  { %2739 = vmatprep.subr.bf16.mxu1 %v3427_v0  ;;  %v2788_v4 = vpack.c.bf16 %v1156_v2, %v1152_v63  ;;  %v1129_v63 = vld [vmem:[%s4650_s14 + $0x50] sm:$0xff] }
 0x4f8   :  { %v1133_v2 = vld [vmem:[%s4650_s14 + $0x70] sm:$0xff] }
 0x4fa   :  { %2741 = vmatpush3.bf16.msra.mxu1 %v2740_v5  ;;  %v1151_v5 = vld [vmem:[%s4650_s14 + $0x100] sm:$0xff] }
 0x4fb   :  { %2742 = vmatprep.subr.bf16.mxu1 %v3427_v0  ;;  %v2790_v9 = vpack.c.bf16 %v1155_v6, %v1151_v5  ;;  %v2810_v5 = vpack.c.bf16 %v1133_v2, %v1129_v63  ;;  %v1351_v2 = vld [vmem:[%s4651_s15 + $0xd0] sm:$0xff] }
 0x4fe   :  { %2744 = vmatpush3.bf16.msra.mxu1 %v2743_v8  ;;  %v1164_v8 = vld [vmem:[%s4650_s14 + $0x168] sm:$0xff] }
 0x4ff   :  { %2745 = vmatprep.subr.bf16.mxu1 %v3427_v0  ;;  %v2792_v10 = vpack.c.bf16 %v1164_v8, %v1160_v7  ;;  %v1137_v7 = vld [vmem:[%s4650_s14 + $0x90] sm:$0xff] }
 0x500   :  { %v1141_v8 = vld [vmem:[%s4650_s14 + $0xb0] sm:$0xff] }
 0x502   :  { %2747 = vmatpush3.bf16.msra.mxu1 %v2746_v11  ;;  %v1159_v11 = vld [vmem:[%s4650_s14 + $0x140] sm:$0xff] }
 0x503   :  { %2773 = vmatprep.subr.bf16.mxu1 %v2772_v50  ;;  %v1172_v50 = vld [vmem:[%s4650_s14 + $0x1a8] sm:$0xff]  ;;  %v2794_v14 = vpack.c.bf16 %v1163_v12, %v1159_v11  ;;  %v2814_v11 = vpack.c.bf16 %v1141_v8, %v1137_v7  ;;  %v1360_v7 = vld [vmem:[%s4651_s15 + $0x118] sm:$0xff] }
 0x504   :  { %v2796_v15 = vpack.c.bf16 %v1172_v50, %v1168_v13  ;;  %v1145_v13 = vld [vmem:[%s4650_s14 + $0xd0] sm:$0xff] }
 0x505   :  { %v1149_v50 = vld [vmem:[%s4650_s14 + $0xf0] sm:$0xff] }
 0x506   :  { %v2818_v16 = vpack.c.bf16 %v1149_v50, %v1145_v13  ;;  %v1359_v50 = vld [vmem:[%s4651_s15 + $0x110] sm:$0xff] }
 0x5b8   :  { %v933_v43 = vpop.f32.mrb[4].mxu1 }
 0x5b9   :  { %v3933_v45 = vadd.f32 %v2067_v40, %v933_v43  ;;  %v2510_v46 = vpop.f32.mrb[5].mxu1  ;;  %v1342_v40 = vld [vmem:[%s4651_s15 + $0x88] sm:$0xff]  ;;  %v1341_v43 = vld [vmem:[%s4651_s15 + $0x80] sm:$0xff] }
 0x5ba   :  { %v2844_v42 = vpack.c.bf16 %v1346_v41, %v1342_v40 }
 0x5bb   :  { %2544 = vmatmul.mubr.f32.vlgmr.msra.gmra.mrb[6].mxu1 %v3933_v45 }
 0x5bc   :  { %2775 = vmatpush1.bf16.msra.mxu1 %v2774_v44  ;;  %1247 = vmatprep.mubr.f32.mxu1 %v3429_v1  ;;  %v1345_v44 = vld [vmem:[%s4651_s15 + $0xa0] sm:$0xff] }
 0x5bd   :  { %2777 = vmatprep.subr.bf16.mxu1 %v2776_v47  ;;  %v2846_v46 = vpack.c.bf16 %v1345_v44, %v1341_v43  ;;  %v1350_v47 = vld [vmem:[%s4651_s15 + $0xc8] sm:$0xff]  ;;  %v1331_v43 = vld [vmem:[%s4651_s15 + $0x30] sm:$0xff]  ;;  %v1336_v44 = vld [vmem:[%s4651_s15 + $0x58] sm:$0xff] }
 0x5be   :  { %v2848_v49 = vpack.c.bf16 %v1354_v48, %v1350_v47 }
 0x5c0   :  { %2779 = vmatpush1.bf16.msra.mxu1 %v2778_v53  ;;  %v2850_v53 = vpack.c.bf16 %v1353_v52, %v1349_v51  ;;  %v1335_v52 = vld [vmem:[%s4651_s15 + $0x50] sm:$0xff] }
 0x5c1   :  { %2781 = vmatprep.subr.bf16.mxu1 %v2780_v54  ;;  %v1121_v54 = vld [vmem:[%s4650_s14 + $0x10] sm:$0xff] }
 0x5c4   :  { %2783 = vmatpush1.bf16.msra.mxu1 %v2782_v59  ;;  %v2806_v59 = vpack.c.bf16 %v1125_v55, %v1121_v54  ;;  %v1344_v54 = vld [vmem:[%s4651_s15 + $0x98] sm:$0xff] }
 0x5c5   :  { %2785 = vmatprep.subr.bf16.mxu1 %v2784_v60  ;;  %v1348_v55 = vld [vmem:[%s4651_s15 + $0xb8] sm:$0xff] }
 0x5c6   :  { %v2876_v57 = vpack.c.bf16 %v1348_v55, %v1344_v54 }
 0x5c8   :  { %2787 = vmatpush1.bf16.msra.mxu1 %v2786_v3  ;;  %v1138_v3 = vld [vmem:[%s4650_s14 + $0x98] sm:$0xff] }
 0x5c9   :  { %2789 = vmatprep.subr.bf16.mxu1 %v2788_v4  ;;  %v1142_v4 = vld [vmem:[%s4650_s14 + $0xb8] sm:$0xff] }
 0x5ca   :  { %v2812_v6 = vpack.c.bf16 %v1142_v4, %v1138_v3  ;;  %v1355_v3 = vld [vmem:[%s4651_s15 + $0xf0] sm:$0xff] }
 0x5cb   :  { %v2882_v4 = vpack.c.bf16 %v1355_v3, %v1351_v2 }
 0x5cc   :  { %2791 = vmatpush1.bf16.msra.mxu1 %v2790_v9  ;;  %v1146_v9 = vld [vmem:[%s4650_s14 + $0xd8] sm:$0xff] }
 0x5cd   :  { %2793 = vmatprep.subr.bf16.mxu1 %v2792_v10  ;;  %v1150_v10 = vld [vmem:[%s4650_s14 + $0xf8] sm:$0xff] }
 0x5ce   :  { %v2816_v12 = vpack.c.bf16 %v1150_v10, %v1146_v9  ;;  %v1364_v9 = vld [vmem:[%s4651_s15 + $0x138] sm:$0xff]  ;;  %v1357_v10 = vld [vmem:[%s4651_s15 + $0x100] sm:$0xff] }
 0x5d0   :  { %2795 = vmatpush1.bf16.msra.mxu1 %v2794_v14  ;;  %v1154_v14 = vld [vmem:[%s4650_s14 + $0x118] sm:$0xff] }
 0x5d1   :  { %2797 = vmatprep.subr.bf16.mxu1 %v2796_v15  ;;  %v1158_v15 = vld [vmem:[%s4650_s14 + $0x138] sm:$0xff] }
 0x5d2   :  { %v2820_v17 = vpack.c.bf16 %v1158_v15, %v1154_v14  ;;  %v1363_v14 = vld [vmem:[%s4651_s15 + $0x130] sm:$0xff] }
 0x5d3   :  { %v2886_v15 = vpack.c.bf16 %v1363_v14, %v1359_v50  ;;  %v1537_v14 = vld [vmem:[%s4652_s16 + $0x10] sm:$0xff] }
 0x5d4   :  { %2799 = vmatpush1.bf16.msra.mxu1 %v2798_v20  ;;  %v1162_v20 = vld [vmem:[%s4650_s14 + $0x158] sm:$0xff] }
 0x5d5   :  { %2801 = vmatprep.subr.bf16.mxu1 %v2800_v21  ;;  %v1166_v21 = vld [vmem:[%s4650_s14 + $0x178] sm:$0xff] }
 0x5d6   :  { %v2824_v23 = vpack.c.bf16 %v1166_v21, %v1162_v20  ;;  %v1372_v20 = vld [vmem:[%s4651_s15 + $0x178] sm:$0xff]  ;;  %v1365_v21 = vld [vmem:[%s4651_s15 + $0x140] sm:$0xff] }
 0x5d8   :  { %2803 = vmatpush1.bf16.msra.mxu1 %v2802_v24  ;;  %v1161_v24 = vld [vmem:[%s4650_s14 + $0x150] sm:$0xff] }
 0x5d9   :  { %2837 = vmatprep.subr.bf16.mxu1 %v2836_v30  ;;  %v2826_v28 = vpack.c.bf16 %v1165_v25, %v1161_v24  ;;  %v1169_v30 = vld [vmem:[%s4650_s14 + $0x190] sm:$0xff] }
 0x5da   :  { %v2830_v34 = vpack.c.bf16 %v1173_v31, %v1169_v30  ;;  %v1367_v25 = vld [vmem:[%s4651_s15 + $0x150] sm:$0xff]  ;;  %v1376_v30 = vld [vmem:[%s4651_s15 + $0x198] sm:$0xff] }
 0x5db   :  { %1248 = vmatmul.mubr.f32.vlgmr.msra.gmra.mrb[8].mxu1 %v3933_v45  ;;  %v1380_v31 = vld [vmem:[%s4651_s15 + $0x1b8] sm:$0xff] }
 0x5dc   :  { %1453 = vmatprep.mubr.f32.mxu1 %v3429_v1  ;;  %2839 = vmatpush1.bf16.msra.mxu1 %v2838_v33  ;;  %v1182_v33 = vld [vmem:[%s4650_s14 + $0x1f8] sm:$0xff] }
 0x5dd   :  { %2841 = vmatprep.subr.bf16.mxu1 %v2840_v36  ;;  %v2832_v35 = vpack.c.bf16 %v1182_v33, %v1178_v32  ;;  %v1177_v36 = vld [vmem:[%s4650_s14 + $0x1d0] sm:$0xff]  ;;  %v2892_v33 = vpack.c.bf16 %v1380_v31, %v1376_v30  ;;  %v1571_v30 = vld [vmem:[%s4652_s16 + $0x120] sm:$0xff]  ;;  %v1572_v31 = vld [vmem:[%s4652_s16 + $0x128] sm:$0xff] }
 0x5de   :  { %v2834_v40 = vpack.c.bf16 %v1181_v37, %v1177_v36  ;;  %v1375_v36 = vld [vmem:[%s4651_s15 + $0x190] sm:$0xff] }
 0x5e0   :  { %2843 = vmatpush1.bf16.msra.mxu1 %v2842_v39  ;;  %v1332_v39 = vld [vmem:[%s4651_s15 + $0x38] sm:$0xff] }
 0x5e1   :  { %2845 = vmatprep.subr.bf16.mxu1 %v2844_v42  ;;  %v2868_v41 = vpack.c.bf16 %v1332_v39, %v1328_v38  ;;  %v1327_v42 = vld [vmem:[%s4651_s15 + $0x10] sm:$0xff]  ;;  %v1382_v39 = vld [vmem:[%s4651_s15 + $0x1c8] sm:$0xff] }
 0x5e2   :  { %v2870_v48 = vpack.c.bf16 %v1331_v43, %v1327_v42  ;;  %v1379_v38 = vld [vmem:[%s4651_s15 + $0x1b0] sm:$0xff]  ;;  %v1384_v43 = vld [vmem:[%s4651_s15 + $0x1d8] sm:$0xff] }
 0x5e4   :  { %2847 = vmatpush1.bf16.msra.mxu1 %v2846_v46  ;;  %v1340_v46 = vld [vmem:[%s4651_s15 + $0x78] sm:$0xff] }
 0x5e5   :  { %2849 = vmatprep.subr.bf16.mxu1 %v2848_v49  ;;  %v2872_v51 = vpack.c.bf16 %v1340_v46, %v1336_v44  ;;  %v1388_v44 = vld [vmem:[%s4651_s15 + $0x1f8] sm:$0xff]  ;;  %v1381_v46 = vld [vmem:[%s4651_s15 + $0x1c0] sm:$0xff] }
 0x5e8   :  { %2851 = vmatpush1.bf16.msra.mxu1 %v2850_v53  ;;  %v1339_v53 = vld [vmem:[%s4651_s15 + $0x70] sm:$0xff] }
 0x5e9   :  { %v2874_v56 = vpack.c.bf16 %v1339_v53, %v1335_v52  ;;  %v1383_v52 = vld [vmem:[%s4651_s15 + $0x1d0] sm:$0xff] }
 0x5ea   :  { %v1387_v53 = vld [vmem:[%s4651_s15 + $0x1f0] sm:$0xff] }
 0x5eb   :  { %v2898_v55 = vpack.c.bf16 %v1387_v53, %v1383_v52 }
 0x68e   :  { %v1019_v58 = vpop.f32.mrb[6].mxu1 }
 0x68f   :  { %v4083_v60 = vmul.f32 %v1019_v58, %v1019_v58  ;;  %v2545_v61 = vpop.f32.mrb[7].mxu1  ;;  %v1343_v58 = vld [vmem:[%s4651_s15 + $0x90] sm:$0xff] }
 0x690   :  { %v1352_v61 = vld [vmem:[%s4651_s15 + $0xd8] sm:$0xff] }
 0x691   :  { %2579 = vmatmul.mubr.f32.vlgmr.msra.gmra.mrb[8].mxu0 %v4083_v60 }
 0x692   :  { %2807 = vmatpush1.bf16.msra.mxu0 %v2806_v59  ;;  %1318 = vmatprep.mubr.f32.mxu0 %v3429_v1  ;;  %v1347_v59 = vld [vmem:[%s4651_s15 + $0xb0] sm:$0xff] }
 0x693   :  { %2809 = vmatprep.subr.bf16.mxu0 %v2808_v62  ;;  %v2878_v62 = vpack.c.bf16 %v1347_v59, %v1343_v58  ;;  %v1583_v58 = vld [vmem:[%s4652_s16 + $0x180] sm:$0xff] }
 0x696   :  { %2811 = vmatpush1.bf16.msra.mxu0 %v2810_v5  ;;  %v1358_v5 = vld [vmem:[%s4651_s15 + $0x108] sm:$0xff] }
 0x697   :  { %2813 = vmatprep.subr.bf16.mxu0 %v2812_v6  ;;  %v1362_v6 = vld [vmem:[%s4651_s15 + $0x128] sm:$0xff] }
 0x698   :  { %v2852_v8 = vpack.c.bf16 %v1362_v6, %v1358_v5  ;;  %v1536_v5 = vld [vmem:[%s4652_s16 + $0x8] sm:$0xff]  ;;  %v1567_v6 = vld [vmem:[%s4652_s16 + $0x100] sm:$0xff] }
 0x69a   :  { %2815 = vmatpush1.bf16.msra.mxu0 %v2814_v11  ;;  %v1361_v11 = vld [vmem:[%s4651_s15 + $0x120] sm:$0xff]  ;;  %2853 = vmatprep.subr.bf16.mxu1 %v2852_v8  ;;  %v1553_v8 = vld [vmem:[%s4652_s16 + $0x90] sm:$0xff] }
 0x69b   :  { %2817 = vmatprep.subr.bf16.mxu0 %v2816_v12  ;;  %v2884_v12 = vpack.c.bf16 %v1364_v9, %v1360_v7  ;;  %v2854_v13 = vpack.c.bf16 %v1361_v11, %v1357_v10  ;;  %v1568_v7 = vld [vmem:[%s4652_s16 + $0x108] sm:$0xff]  ;;  %v1554_v9 = vld [vmem:[%s4652_s16 + $0x98] sm:$0xff]  ;;  %v1585_v10 = vld [vmem:[%s4652_s16 + $0x190] sm:$0xff] }
 0x69c   :  { %v1586_v11 = vld [vmem:[%s4652_s16 + $0x198] sm:$0xff]  ;;  %v2934_v50 = vpack.c.bf16 %v1568_v7, %v1567_v6 }
 0x69d   :  { %2855 = vmatpush1.bf16.msra.mxu1 %v2854_v13 }
 0x69e   :  { %2819 = vmatpush1.bf16.msra.mxu0 %v2818_v16  ;;  %v1366_v16 = vld [vmem:[%s4651_s15 + $0x148] sm:$0xff] }
 0x69f   :  { %2821 = vmatprep.subr.bf16.mxu0 %v2820_v17  ;;  %v1370_v17 = vld [vmem:[%s4651_s15 + $0x168] sm:$0xff] }
 0x6a0   :  { %v2856_v19 = vpack.c.bf16 %v1370_v17, %v1366_v16  ;;  %v2904_v17 = vpack.c.bf16 %v1554_v9, %v1553_v8  ;;  %v1577_v8 = vld [vmem:[%s4652_s16 + $0x150] sm:$0xff]  ;;  %v1578_v9 = vld [vmem:[%s4652_s16 + $0x158] sm:$0xff] }
 0x6a2   :  { %2823 = vmatpush1.bf16.msra.mxu0 %v2822_v22  ;;  %v1369_v22 = vld [vmem:[%s4651_s15 + $0x160] sm:$0xff]  ;;  %2857 = vmatprep.subr.bf16.mxu1 %v2856_v19  ;;  %v1569_v19 = vld [vmem:[%s4652_s16 + $0x110] sm:$0xff] }
 0x6a3   :  { %2825 = vmatprep.subr.bf16.mxu0 %v2824_v23  ;;  %v2888_v23 = vpack.c.bf16 %v1372_v20, %v1368_v18  ;;  %v2858_v24 = vpack.c.bf16 %v1369_v22, %v1365_v21  ;;  %v2936_v18 = vpack.c.bf16 %v1586_v11, %v1585_v10  ;;  %v1570_v20 = vld [vmem:[%s4652_s16 + $0x118] sm:$0xff]  ;;  %v1555_v21 = vld [vmem:[%s4652_s16 + $0xa0] sm:$0xff]  ;;  %v1556_v22 = vld [vmem:[%s4652_s16 + $0xa8] sm:$0xff] }
 0x6a4   :  { %v1563_v10 = vld [vmem:[%s4652_s16 + $0xe0] sm:$0xff]  ;;  %v1564_v11 = vld [vmem:[%s4652_s16 + $0xe8] sm:$0xff] }
 0x6a5   :  { %2859 = vmatpush1.bf16.msra.mxu1 %v2858_v24 }
 0x6a6   :  { %2827 = vmatpush1.bf16.msra.mxu0 %v2826_v28  ;;  %v2890_v28 = vpack.c.bf16 %v1371_v26, %v1367_v25  ;;  %v2938_v25 = vpack.c.bf16 %v1570_v20, %v1569_v19  ;;  %v1539_v26 = vld [vmem:[%s4652_s16 + $0x20] sm:$0xff]  ;;  %v2924_v19 = vpack.c.bf16 %v1564_v11, %v1563_v10  ;;  %v1867_v10 = vld [vmem:[%s4656_s20 + $0x90] sm:$0xff]  ;;  %v1868_v11 = vld [vmem:[%s4656_s20 + $0x98] sm:$0xff] }
 0x6a7   :  { %2829 = vmatprep.subr.bf16.mxu0 %v2828_v29  ;;  %v1378_v29 = vld [vmem:[%s4651_s15 + $0x1a8] sm:$0xff] }
 0x6a8   :  { %v2860_v32 = vpack.c.bf16 %v1378_v29, %v1374_v27  ;;  %v1540_v27 = vld [vmem:[%s4652_s16 + $0x28] sm:$0xff] }
 0x6aa   :  { %2831 = vmatpush1.bf16.msra.mxu0 %v2830_v34  ;;  %v1373_v34 = vld [vmem:[%s4651_s15 + $0x180] sm:$0xff]  ;;  %2861 = vmatprep.subr.bf16.mxu1 %v2860_v32  ;;  %v1557_v32 = vld [vmem:[%s4652_s16 + $0xb0] sm:$0xff] }
 0x6ab   :  { %2833 = vmatprep.subr.bf16.mxu0 %v2832_v35  ;;  %v1377_v35 = vld [vmem:[%s4651_s15 + $0x1a0] sm:$0xff] }
 0x6ac   :  { %v2862_v37 = vpack.c.bf16 %v1377_v35, %v1373_v34  ;;  %v1589_v34 = vld [vmem:[%s4652_s16 + $0x1b0] sm:$0xff]  ;;  %v1590_v35 = vld [vmem:[%s4652_s16 + $0x1b8] sm:$0xff] }
 0x6ae   :  { %v4183_v47 = vpop.f32.mrb[8].mxu1  ;;  %2835 = vmatpush1.bf16.msra.mxu0 %v2834_v40  ;;  %v1386_v40 = vld [vmem:[%s4651_s15 + $0x1e8] sm:$0xff]  ;;  %2863 = vmatpush1.bf16.msra.mxu1 %v2862_v37  ;;  %v2942_v37 = vpack.c.bf16 %v1572_v31, %v1571_v30  ;;  %v1549_v30 = vld [vmem:[%s4652_s16 + $0x70] sm:$0xff]  ;;  %v1550_v31 = vld [vmem:[%s4652_s16 + $0x78] sm:$0xff] }
 0x6af   :  { %v4185_v49 = vpop.f32.mrb[9].mxu1  ;;  %2869 = vmatprep.subr.bf16.mxu0 %v2868_v41  ;;  %v2894_v41 = vpack.c.bf16 %v1379_v38, %v1375_v36  ;;  %v2864_v42 = vpack.c.bf16 %v1386_v40, %v1382_v39  ;;  %v2910_v36 = vpack.c.bf16 %v1540_v27, %v1539_v26  ;;  %v1541_v38 = vld [vmem:[%s4652_s16 + $0x30] sm:$0xff]  ;;  %v1542_v39 = vld [vmem:[%s4652_s16 + $0x38] sm:$0xff] }
 0x6b0   :  { %v2914_v52 = vpack.c.bf16 %v1542_v39, %v1541_v38  ;;  %v1566_v26 = vld [vmem:[%s4652_s16 + $0xf8] sm:$0xff]  ;;  %v1597_v27 = vld [vmem:[%s4652_s16 + $0x1f0] sm:$0xff] }
 0x6b1   :  { %1319 = vmatmul.mubr.f32.vlgmr.msra.gmra.mrb[10].mxu0 %v3933_v45  ;;  %v1356_v45 = vld [vmem:[%s4651_s15 + $0xf8] sm:$0xff]  ;;  %2865 = vmatprep.subr.bf16.mxu1 %v2864_v42  ;;  %v1573_v42 = vld [vmem:[%s4652_s16 + $0x130] sm:$0xff] }
 0x6b2   :  { %2871 = vmatpush1.bf16.msra.mxu0 %v2870_v48  ;;  %1524 = vmatprep.mubr.f32.mxu0 %v3429_v1  ;;  %v2880_v63 = vpack.c.bf16 %v1356_v45, %v1352_v61  ;;  %v2896_v48 = vpack.c.bf16 %v1388_v44, %v1384_v43  ;;  %v1584_v61 = vld [vmem:[%s4652_s16 + $0x188] sm:$0xff]  ;;  %v1574_v43 = vld [vmem:[%s4652_s16 + $0x138] sm:$0xff]  ;;  %v1559_v44 = vld [vmem:[%s4652_s16 + $0xc0] sm:$0xff] }
 0x6b3   :  { %2873 = vmatprep.subr.bf16.mxu0 %v2872_v51  ;;  %v1385_v51 = vld [vmem:[%s4651_s15 + $0x1e0] sm:$0xff]  ;;  %v2932_v45 = vpack.c.bf16 %v1584_v61, %v1583_v58  ;;  %v2946_v53 = vpack.c.bf16 %v1574_v43, %v1573_v42  ;;  %v1561_v61 = vld [vmem:[%s4652_s16 + $0xd0] sm:$0xff] }
 0x6b4   :  { %v2866_v54 = vpack.c.bf16 %v1385_v51, %v1381_v46  ;;  %v1560_v46 = vld [vmem:[%s4652_s16 + $0xc8] sm:$0xff]  ;;  %v1575_v58 = vld [vmem:[%s4652_s16 + $0x140] sm:$0xff] }
 0x6b5   :  { %v1592_v51 = vld [vmem:[%s4652_s16 + $0x1c8] sm:$0xff] }
 0x6b6   :  { %2875 = vmatpush1.bf16.msra.mxu0 %v2874_v56  ;;  %2867 = vmatpush1.bf16.msra.mxu1 %v2866_v54  ;;  %v1551_v56 = vld [vmem:[%s4652_s16 + $0x80] sm:$0xff] }
 0x6b7   :  { %2877 = vmatprep.subr.bf16.mxu0 %v2876_v57  ;;  %v1552_v57 = vld [vmem:[%s4652_s16 + $0x88] sm:$0xff]  ;;  %v1543_v54 = vld [vmem:[%s4652_s16 + $0x40] sm:$0xff] }
 0x6b8   :  { %v2900_v59 = vpack.c.bf16 %v1552_v57, %v1551_v56  ;;  %v2916_v56 = vpack.c.bf16 %v1560_v46, %v1559_v44  ;;  %v1750_v46 = vld [vmem:[#allocation22 + $0x8] sm:$0xff] }
 0x6ba   :  { %2879 = vmatpush1.bf16.msra.mxu0 %v2878_v62  ;;  %2901 = vmatprep.subr.bf16.mxu1 %v2900_v59  ;;  %v2069_v62 = vld [vmem:[#allocation19] ss:$0 sm:$0xff] }
 0x6bb   :  { %2881 = vmatprep.subr.bf16.mxu0 %v2880_v63  ;;  %v1576_v59 = vld [vmem:[%s4652_s16 + $0x148] sm:$0xff] }
 0x6be   :  { %2883 = vmatpush1.bf16.msra.mxu0 %v2882_v4  ;;  %v1535_v4 = vld [vmem:[%s4652_s16] sm:$0xff] }
 0x6bf   :  { %2885 = vmatprep.subr.bf16.mxu0 %v2884_v12  ;;  %v2902_v13 = vpack.c.bf16 %v1536_v5, %v1535_v4  ;;  %v1545_v4 = vld [vmem:[%s4652_s16 + $0x50] sm:$0xff]  ;;  %v1546_v5 = vld [vmem:[%s4652_s16 + $0x58] sm:$0xff] }
 0x6c2   :  { %2887 = vmatpush1.bf16.msra.mxu0 %v2886_v15  ;;  %v1538_v15 = vld [vmem:[%s4652_s16 + $0x18] sm:$0xff] }
 0x6c3   :  { %2889 = vmatprep.subr.bf16.mxu0 %v2888_v23  ;;  %v1588_v23 = vld [vmem:[%s4652_s16 + $0x1a8] sm:$0xff]  ;;  %v2906_v24 = vpack.c.bf16 %v1538_v15, %v1537_v14  ;;  %v2922_v15 = vpack.c.bf16 %v1546_v5, %v1545_v4 }
 0x6c6   :  { %2891 = vmatpush1.bf16.msra.mxu0 %v2890_v28  ;;  %v2908_v28 = vpack.c.bf16 %v1556_v22, %v1555_v21  ;;  %v1548_v21 = vld [vmem:[%s4652_s16 + $0x68] sm:$0xff]  ;;  %v1579_v22 = vld [vmem:[%s4652_s16 + $0x160] sm:$0xff] }
 0x6c7   :  { %2893 = vmatprep.subr.bf16.mxu0 %v2892_v33  ;;  %v1558_v33 = vld [vmem:[%s4652_s16 + $0xb8] sm:$0xff] }
 0x6c8   :  { %v2912_v40 = vpack.c.bf16 %v1558_v33, %v1557_v32  ;;  %v2930_v33 = vpack.c.bf16 %v1550_v31, %v1549_v30  ;;  %v1874_v30 = vld [vmem:[%s4656_s20 + $0xc8] sm:$0xff] }
 0x6ca   :  { %2895 = vmatpush1.bf16.msra.mxu0 %v2894_v41  ;;  %v2944_v41 = vpack.c.bf16 %v1590_v35, %v1589_v34  ;;  %v1581_v34 = vld [vmem:[%s4652_s16 + $0x170] sm:$0xff]  ;;  %v1582_v35 = vld [vmem:[%s4652_s16 + $0x178] sm:$0xff] }
 0x6cb   :  { %2897 = vmatprep.subr.bf16.mxu0 %v2896_v48  ;;  %v1591_v48 = vld [vmem:[%s4652_s16 + $0x1c0] sm:$0xff] }
 0x6cc   :  { %v2948_v57 = vpack.c.bf16 %v1592_v51, %v1591_v48  ;;  %v1752_v48 = vld [vmem:[#allocation22 + $0x18] sm:$0xff] }
 0x6cd   :  { %v2964_v51 = vpack.c.bf16 %v1752_v48, %v1750_v46  ;;  %v1861_v46 = vld [vmem:[%s4656_s20 + $0x60] sm:$0xff]  ;;  %v1862_v48 = vld [vmem:[%s4656_s20 + $0x68] sm:$0xff] }
 0x6ce   :  { %2899 = vmatpush1.bf16.msra.mxu0 %v2898_v55  ;;  %v1544_v55 = vld [vmem:[%s4652_s16 + $0x48] sm:$0xff] }
 0x6cf   :  { %2933 = vmatprep.subr.bf16.mxu0 %v2932_v45  ;;  %v1562_v45 = vld [vmem:[%s4652_s16 + $0xd8] sm:$0xff] }
 0x6d0   :  { %v2920_v6 = vpack.c.bf16 %v1562_v45, %v1561_v61 }
 0x764   :  { %v1113_v63 = vpop.f32.mrb[8].mxu0 }
 0x765   :  { %v1114_v2 = vadd.f32 %v2069_v62, %v1113_v63  ;;  %v2580_v3 = vpop.f32.mrb[9].mxu0  ;;  %v1593_v62 = vld [vmem:[%s4652_s16 + $0x1d0] sm:$0xff]  ;;  %v1594_v63 = vld [vmem:[%s4652_s16 + $0x1d8] sm:$0xff] }
 0x766   :  { %v2950_v3 = vpack.c.bf16 %v1576_v59, %v1575_v58  ;;  %v2952_v7 = vpack.c.bf16 %v1594_v63, %v1593_v62  ;;  %v1866_v59 = vld [vmem:[%s4656_s20 + $0x88] sm:$0xff] }
 0x767   :  { %3034 = vrcp.f32 %v1114_v2  ;;  %v2918_v2 = vpack.c.bf16 %v1544_v55, %v1543_v54  ;;  %v1754_v54 = vld [vmem:[#allocation22 + $0x28] sm:$0xff]  ;;  %v2070_v63 = vld [vmem:[#allocation21] ss:$0 sm:$0xff] }
 0x771   :  { %v3035_v12 = vpop.eup %3034 }
 0x772   :  { %v4358_v16 = vmul.f32 %v3035_v12, %v4083_v60  ;;  %v1587_v60 = vld [vmem:[%s4652_s16 + $0x1a0] sm:$0xff] }
 0x773   :  { %v2940_v29 = vpack.c.bf16 %v1588_v23, %v1587_v60  ;;  %v1595_v12 = vld [vmem:[%s4652_s16 + $0x1e0] sm:$0xff]  ;;  %v1580_v60 = vld [vmem:[%s4652_s16 + $0x168] sm:$0xff] }
 0x774   :  { %1454 = vmatmul.mubr.f32.vlgmr.msra.gmra.mrb[10].mxu1 %v4358_v16  ;;  %1525 = vmatmul.mubr.f32.vlgmr.msra.gmra.mrb[12].mxu0 %v4358_v16 }
 0x775   :  { %2903 = vmatpush3.bf16.msra.mxu1 %v2902_v13  ;;  %2935 = vmatpush3.bf16.msra.mxu0 %v2934_v50  ;;  %v1596_v13 = vld [vmem:[%s4652_s16 + $0x1e8] sm:$0xff] }
 0x776   :  { %2905 = vmatprep.subr.bf16.mxu1 %v2904_v17  ;;  %2937 = vmatprep.subr.bf16.mxu0 %v2936_v18  ;;  %v2954_v17 = vpack.c.bf16 %v1578_v9, %v1577_v8  ;;  %v1547_v18 = vld [vmem:[%s4652_s16 + $0x60] sm:$0xff]  ;;  %v2956_v20 = vpack.c.bf16 %v1596_v13, %v1595_v12  ;;  %v1850_v8 = vld [vmem:[%s4656_s20 + $0x8] sm:$0xff] }
 0x777   :  { %v2926_v23 = vpack.c.bf16 %v1548_v21, %v1547_v18  ;;  %v1869_v18 = vld [vmem:[%s4656_s20 + $0xa0] sm:$0xff] }
 0x779   :  { %2907 = vmatpush3.bf16.msra.mxu1 %v2906_v24  ;;  %2939 = vmatpush3.bf16.msra.mxu0 %v2938_v25  ;;  %v2958_v24 = vpack.c.bf16 %v1580_v60, %v1579_v22  ;;  %v1565_v25 = vld [vmem:[%s4652_s16 + $0xf0] sm:$0xff]  ;;  %v1853_v22 = vld [vmem:[%s4656_s20 + $0x20] sm:$0xff]  ;;  %v1854_v60 = vld [vmem:[%s4656_s20 + $0x28] sm:$0xff] }
 0x77a   :  { %2909 = vmatprep.subr.bf16.mxu1 %v2908_v28  ;;  %2941 = vmatprep.subr.bf16.mxu0 %v2940_v29  ;;  %v2928_v28 = vpack.c.bf16 %v1566_v26, %v1565_v25  ;;  %v1598_v29 = vld [vmem:[%s4652_s16 + $0x1f8] sm:$0xff]  ;;  %v2982_v25 = vpack.c.bf16 %v1854_v60, %v1853_v22 }
 0x77b   :  { %v2960_v32 = vpack.c.bf16 %v1598_v29, %v1597_v27  ;;  %v1855_v27 = vld [vmem:[%s4656_s20 + $0x30] sm:$0xff]  ;;  %v1873_v29 = vld [vmem:[%s4656_s20 + $0xc0] sm:$0xff] }
 0x77d   :  { %2911 = vmatpush3.bf16.msra.mxu1 %v2910_v36  ;;  %2943 = vmatpush3.bf16.msra.mxu0 %v2942_v37  ;;  %v2962_v36 = vpack.c.bf16 %v1582_v35, %v1581_v34  ;;  %v1858_v34 = vld [vmem:[%s4656_s20 + $0x48] sm:$0xff]  ;;  %v1875_v35 = vld [vmem:[%s4656_s20 + $0xd0] sm:$0xff] }
 0x77e   :  { %2913 = vmatprep.subr.bf16.mxu1 %v2912_v40  ;;  %2945 = vmatprep.subr.bf16.mxu0 %v2944_v41 }
 0x781   :  { %2915 = vmatpush3.bf16.msra.mxu1 %v2914_v52  ;;  %2947 = vmatpush3.bf16.msra.mxu0 %v2946_v53  ;;  %v1749_v52 = vld [vmem:[#allocation22] sm:$0xff] }
 0x782   :  { %2917 = vmatprep.subr.bf16.mxu1 %v2916_v56  ;;  %2949 = vmatprep.subr.bf16.mxu0 %v2948_v57  ;;  %v1753_v56 = vld [vmem:[#allocation22 + $0x20] sm:$0xff]  ;;  %v1755_v57 = vld [vmem:[#allocation22 + $0x30] sm:$0xff] }
 0x783   :  { %v2970_v58 = vpack.c.bf16 %v1755_v57, %v1753_v56  ;;  %v1759_v56 = vlaneseq }
 0x784   :  { %v1320_v50 = vpop.f32.mrb[10].mxu0 }
 0x785   :  { %v1322_v14 = vpop.f32.mrb[11].mxu0  ;;  %2919 = vmatpush3.bf16.msra.mxu1 %v2918_v2  ;;  %2951 = vmatpush3.bf16.msra.mxu0 %v2950_v3  ;;  %v1760_v57 = vshrl.u32 %v1759_v56, 7 }
 0x786   :  { %2921 = vmatprep.subr.bf16.mxu1 %v2920_v6  ;;  %2953 = vmatprep.subr.bf16.mxu0 %v2952_v7  ;;  %v1849_v7 = vld [vmem:[%s4656_s20] sm:$0xff] }
 0x787   :  { %v2974_v13 = vpack.c.bf16 %v1850_v8, %v1849_v7  ;;  %v1961_v8 = vld [vmem:[%s4692_s19] sm:$0xff] }
 0x789   :  { %2923 = vmatpush3.bf16.msra.mxu1 %v2922_v15  ;;  %2955 = vmatpush3.bf16.msra.mxu0 %v2954_v17  ;;  %v1852_v15 = vld [vmem:[%s4656_s20 + $0x18] sm:$0xff] }
 0x78a   :  { %2925 = vmatprep.subr.bf16.mxu1 %v2924_v19  ;;  %2957 = vmatprep.subr.bf16.mxu0 %v2956_v20  ;;  %v1870_v19 = vld [vmem:[%s4656_s20 + $0xa8] sm:$0xff] }
 0x78b   :  { %v2980_v21 = vpack.c.bf16 %v1870_v19, %v1869_v18 }
 0x78d   :  { %2927 = vmatpush3.bf16.msra.mxu1 %v2926_v23  ;;  %2959 = vmatpush3.bf16.msra.mxu0 %v2958_v24  ;;  %v1871_v23 = vld [vmem:[%s4656_s20 + $0xb0] sm:$0xff]  ;;  %v1872_v24 = vld [vmem:[%s4656_s20 + $0xb8] sm:$0xff] }
 0x78e   :  { %2929 = vmatprep.subr.bf16.mxu1 %v2928_v28  ;;  %2961 = vmatprep.subr.bf16.mxu0 %v2960_v32  ;;  %v2984_v26 = vpack.c.bf16 %v1872_v24, %v1871_v23  ;;  %v1856_v28 = vld [vmem:[%s4656_s20 + $0x38] sm:$0xff]  ;;  %v2988_v32 = vpack.c.bf16 %v1874_v30, %v1873_v29 }
 0x78f   :  { %v2986_v31 = vpack.c.bf16 %v1856_v28, %v1855_v27 }
 0x791   :  { %2931 = vmatpush3.bf16.msra.mxu1 %v2930_v33  ;;  %2963 = vmatpush3.bf16.msra.mxu0 %v2962_v36  ;;  %v1857_v33 = vld [vmem:[%s4656_s20 + $0x40] sm:$0xff]  ;;  %v1876_v36 = vld [vmem:[%s4656_s20 + $0xd8] sm:$0xff] }
 0x792   :  { %3004 = vmatprep.subr.bf16.mxu0 %v3427_v0  ;;  %2965 = vmatprep.subr.bf16.mxu1 %v2964_v51  ;;  %v2998_v51 = vpack.c.bf16 %v1862_v48, %v1861_v46 }
 0x847   :  { %v1455_v37 = vpop.f32.mrb[10].mxu1  ;;  %v1526_v38 = vpop.f32.mrb[12].mxu0 }
 0x848   :  { %v1531_v39 = vmul.f32 %v1455_v37, %v4183_v47  ;;  %v1533_v40 = vmul.f32 %v1526_v38, %v1320_v50  ;;  %v1457_v41 = vpop.f32.mrb[11].mxu1  ;;  %v1528_v42 = vpop.f32.mrb[13].mxu0  ;;  %v1751_v47 = vld [vmem:[#allocation22 + $0x10] sm:$0xff]  ;;  %v2976_v50 = vpack.c.bf16 %v1868_v11, %v1867_v10  ;;  %v2990_v37 = vpack.c.bf16 %v1858_v34, %v1857_v33  ;;  %v1963_v11 = vld [vmem:[%s4692_s19 + $0x10] sm:$0xff] }
 0x849   :  { %v1532_v43 = vmul.f32 %v1457_v41, %v4185_v49  ;;  %v1534_v44 = vmul.f32 %v1528_v42, %v1322_v14  ;;  %v2966_v53 = vpack.c.bf16 %v1751_v47, %v1749_v52  ;;  %v1756_v49 = vld [vmem:[#allocation22 + $0x38] sm:$0xff]  ;;  %v1851_v14 = vld [vmem:[%s4656_s20 + $0x10] sm:$0xff]  ;;  %v2992_v38 = vpack.c.bf16 %v1876_v36, %v1875_v35  ;;  %v1880_v47 = vld [vmem:[%s4656_s20 + $0xf8] sm:$0xff] }
 0x84a   :  { %v2968_v55 = vpack.c.bf16 %v1756_v49, %v1754_v54  ;;  %v2978_v20 = vpack.c.bf16 %v1852_v15, %v1851_v14  ;;  %v1877_v42 = vld [vmem:[%s4656_s20 + $0xe0] sm:$0xff]  ;;  %v1879_v52 = vld [vmem:[%s4656_s20 + $0xf0] sm:$0xff]  ;;  %v1864_v49 = vld [vmem:[%s4656_s20 + $0x78] sm:$0xff] }
 0x84b   :  { %1670 = vmatprep.mubr.f32.mxu1 %v1532_v43  ;;  %1740 = vmatprep.mubr.f32.mxu0 %v1534_v44  ;;  %v1878_v43 = vld [vmem:[%s4656_s20 + $0xe8] sm:$0xff]  ;;  %v1863_v54 = vld [vmem:[%s4656_s20 + $0x70] sm:$0xff] }
 0x84c   :  { %1671 = vmatmul.mubr.f32.vlgmr.msra.gmra.mrb[12].mxu1 %v1531_v39  ;;  %1741 = vmatmul.mubr.f32.vlgmr.msra.gmra.mrb[14].mxu0 %v1533_v40  ;;  %v1859_v39 = vld [vmem:[%s4656_s20 + $0x50] sm:$0xff]  ;;  %v1860_v40 = vld [vmem:[%s4656_s20 + $0x58] sm:$0xff]  ;;  %v2996_v44 = vpack.c.bf16 %v1878_v43, %v1877_v42  ;;  %v2072_v14 = vld [vmem:[#allocation24] ss:$0 sm:$0xff] }
 0x84d   :  { %1836 = vmatprep.mubr.f32.mxu1 %v3429_v1  ;;  %2589 = vmatprep.mubr.msk.f32.mxu0 %vm3428_vm0, %v3429_v1  ;;  %v1865_v1 = vld [vmem:[%s4656_s20 + $0x80] sm:$0xff]  ;;  %v2994_v41 = vpack.c.bf16 %v1860_v40, %v1859_v39 }
 0x84e   :  { %2967 = vmatpush1.bf16.msra.mxu1 %v2966_v53  ;;  %v2972_v61 = vpack.c.bf16 %v1866_v59, %v1865_v1  ;;  %v3000_v53 = vpack.c.bf16 %v1880_v47, %v1879_v52  ;;  %v1757_v1 = vld [vmem:[%s4691_s28] sm:$0x3]  ;;  %v1765_v59 = vsub.s32 1, %v1760_v57 }
 0x84f   :  { %2969 = vmatprep.subr.bf16.mxu1 %v2968_v55  ;;  %v3002_v55 = vpack.c.bf16 %v1864_v49, %v1863_v54 }
 0x852   :  { %2971 = vmatpush1.bf16.msra.mxu1 %v2970_v58  ;;  %v1761_v58 = vsub.s32 0, %v1760_v57 }
 0x853   :  { %2973 = vmatprep.subr.bf16.mxu1 %v2972_v61 }
 0x854   :  { %v1762_v61 = vrot.slane %v1757_v1, %v1761_v58 }
 0x91f   :  { %v2236_v45 = vpop.f32.mrb[12].mxu1  ;;  %v2271_v62 = vpop.f32.mrb[14].mxu0 }
 0x920   :  { %v2237_v2 = vpop.f32.mrb[13].mxu1  ;;  %v2272_v3 = vpop.f32.mrb[15].mxu0 }
 0x921   :  { %v2238_v4 = vadd.f32 %v2237_v2, %v2236_v45  ;;  %v2273_v5 = vadd.f32 %v2272_v3, %v2271_v62  ;;  %v1766_v45 = vrot.slane %v1757_v1, %v1765_v59 }
 0x923   :  { %v1673_v6 = vadd.f32 %v2238_v4, %v2070_v63 }
 0x925   :  { %v1743_v9 = vadd.f32 %v2273_v5, %v1673_v6 }
 0x927   :  { %vm1746_vm6 = vcmp.gt.f32.partialorder %v1743_v9, 0.0  ;;  %v1747_v12 = vmul.f32 0.01, %v1743_v9 }
 0x929   :  { %v1748_v17 = vsel %vm1746_vm6, %v1743_v9, %v1747_v12  ;;  %v1962_v9 = vld [vmem:[%s4692_s19 + $0x8] sm:$0xff]  ;;  %v1964_v12 = vld [vmem:[%s4692_s19 + $0x18] sm:$0xff] }
 0x92a   :  { %2071 = vmatmul.mubr.msk.f32.vlgmr.msra.gmra.mrb[14].mxu1 %vm776_vm4, %v1748_v17  ;;  %v3005_v10 = vpack.c.bf16 %v1962_v9, %v1961_v8 }
 0x92b   :  { %2975 = vmatpush3.bf16.msra.mxu1 %v2974_v13  ;;  %v3008_v13 = vpack.c.bf16 %v1964_v12, %v1963_v11 }
 0x92c   :  { %2977 = vmatprep.subr.bf16.mxu1 %v2976_v50  ;;  %3006 = vmatpush3.bf16.msra.mxu0 %v3005_v10 }
 0x92d   :  { %3007 = vmatprep.subr.bf16.mxu0 %v3427_v0  ;;  %v2073_v0 = vld [vmem:[#allocation25] ss:$0 sm:$0xff] }
 0x92f   :  { %2979 = vmatpush3.bf16.msra.mxu1 %v2978_v20 }
 0x930   :  { %2981 = vmatprep.subr.bf16.mxu1 %v2980_v21  ;;  %3009 = vmatpush3.bf16.msra.mxu0 %v3008_v13 }
 0x933   :  { %2983 = vmatpush3.bf16.msra.mxu1 %v2982_v25 }
 0x934   :  { %2985 = vmatprep.subr.bf16.mxu1 %v2984_v26 }
 0x937   :  { %2987 = vmatpush3.bf16.msra.mxu1 %v2986_v31 }
 0x938   :  { %2989 = vmatprep.subr.bf16.mxu1 %v2988_v32 }
 0x93b   :  { %2991 = vmatpush3.bf16.msra.mxu1 %v2990_v37 }
 0x93c   :  { %2993 = vmatprep.subr.bf16.mxu1 %v2992_v38 }
 0x93f   :  { %2995 = vmatpush3.bf16.msra.mxu1 %v2994_v41 }
 0x940   :  { %2997 = vmatprep.subr.bf16.mxu1 %v2996_v44 }
 0x943   :  { %2999 = vmatpush3.bf16.msra.mxu1 %v2998_v51 }
 0x944   :  { %3001 = vmatprep.subr.bf16.mxu1 %v3000_v53 }
 0x947   :  { %3003 = vmatpush3.bf16.msra.mxu1 %v3002_v55 }
 0x9fd   :  { %v1838_v62 = vpop.f32.mrb[14].mxu1 }
 0x9fe   :  { %v1839_v63 = vadd.f32 %v1838_v62, %v1762_v61  ;;  %v1840_v2 = vpop.f32.mrb[15].mxu1 }
 0x9ff   :  { %v1841_v3 = vadd.f32 %v1840_v2, %v1766_v45 }
 0xa00   :  { %v1845_v4 = vmul.f32 0.01, %v1839_v63  ;;  %vm1843_vm7 = vcmp.gt.f32.partialorder %v1839_v63, 0.0 }
 0xa01   :  { %v1846_v5 = vmul.f32 0.01, %v1841_v3  ;;  %vm1844_vm8 = vcmp.gt.f32.partialorder %v1841_v3, 0.0 }
 0xa02   :  { %v1847_v7 = vsel %vm1843_vm7, %v1839_v63, %v1845_v4 }
 0xa03   :  { %v1848_v6 = vsel %vm1844_vm8, %v1841_v3, %v1846_v5 }
 0xa04   :  { %1952 = vmatprep.mubr.f32.mxu1 %v1848_v6 }
 0xa05   :  { %1953 = vmatmul.mubr.f32.vlgmr.msra.gmra.mrb[16].mxu1 %v1847_v7 }
 0xad8   :  { %v2306_v50 = vpop.f32.mrb[16].mxu1 }
 0xad9   :  { %v2307_v15 = vpop.f32.mrb[17].mxu1 }
 0xada   :  { %v2308_v17 = vadd.f32 %v2307_v15, %v2306_v50 }
 0xadc   :  { %v1955_v18 = vadd.f32 %v2308_v17, %v2072_v14 }
 0xade   :  { %vm1958_vm9 = vcmp.gt.f32.partialorder %v1955_v18, 0.0  ;;  %v1959_v19 = vmul.f32 0.01, %v1955_v18 }
 0xae0   :  { %v1960_v20 = vsel %vm1958_vm9, %v1955_v18, %v1959_v19 }
 0xae1   :  { %2590 = vmatmul.mubr.msk.f32.vlgmr.msra.gmra.mrb[16].mxu0 %vm776_vm4, %v1960_v20 }
 0xbb4   :  { %v2041_v21 = vpop.f32.mrb[16].mxu0 }
 0xbb5   :  { %v2042_v22 = vadd.f32 %v2073_v0, %v2041_v21  ;;  %v2591_v60 = vpop.f32.mrb[17].mxu0 }
 0xbb7   :  { %v2045_v23 = vadd.f32 %v2042_v22, %v4358_v16 }
 0xbb9   :  { %2046 = vst [vmem:[%s4693_s24] sm:$0x3] %v2045_v23 }
 0xbba   :  { %2051 = vsyncpa [#allocation3], 1 }
 0xbbb   :  { %2052 = vsyncpa [#allocation5], 1 }
 0xbbc   :  { %2053 = vsyncpa [#allocation8], 1 }
 0xbbd   :  { %2054 = vsyncpa [#allocation11], 1 }
 0xbbe   :  { %2055 = vsyncpa [#allocation14], 1 }
 0xbbf   :  { %2056 = vsyncpa [#allocation17], 1 }
 0xbc0   :  { %2057 = vsyncpa [#allocation20], 1 }
 0xbc1   :  { %2058 = vsyncpa [#allocation23], 1 }
 0xbc2   :  { %2059 = vsyncpa [#allocation26], 1 }

</bundles_post_ra>
